<compile_context>
chip_gen: v7x
topology: tpu7x:2x2x1
jax: 0.10.0
libtpu: 0.0.40
codegen_flags: <defaults>
</compile_context>

<pallas_src>
import functools
import numpy as np
import jax
import jax.numpy as jnp
from jax.experimental import pallas as pl
from jax.experimental.pallas import tpu as pltpu


# ----------------------------- static filter constants -----------------------------

def _gaussian_kernel_np(kernel_size: int, sigma: float = 1.0) -> np.ndarray:
    coords = np.arange(kernel_size, dtype=np.float32) - (kernel_size // 2)
    g_x = np.repeat(coords[:, None], kernel_size, axis=1)
    g_y = np.repeat(coords[None, :], kernel_size, axis=0)
    g = np.exp(-(g_x ** 2 + g_y ** 2) / (2.0 * sigma ** 2)).astype(np.float32)
    return g / g.sum()


_LAPLACIAN = np.array([[0, 1, 0], [1, -4, 1], [0, 1, 0]], dtype=np.float32)
_SOBEL_X = np.array([[-1, 0, 1], [-2, 0, 2], [-1, 0, 1]], dtype=np.float32)
_SOBEL_Y = np.array([[-1, -2, -1], [0, 0, 0], [1, 2, 1]], dtype=np.float32)


# ----------------------------------- Pallas kernel ----------------------------------

def _lr_kernel(w_ref, b_ref, x_ref, out_ref, xp_scr, *, H, W, ksize, P, num_classes):
    """One batch tile per grid step.

    w_ref : (num_classes*6,)            SMEM  -- flattened 1x1 conv weights
    b_ref : (num_classes,)              SMEM  -- 1x1 conv bias
    x_ref : (BT, 1, H, W)               VMEM  -- channel 0 of the input tile
    out_ref: (BT, num_classes, H, W)    VMEM
    xp_scr: (BT, H+2P, W+2P)            VMEM scratch -- zero-padded tile
    """
    BT = x_ref.shape[0]
    k2 = float(ksize * ksize)
    gk = _gaussian_kernel_np(ksize)        # static python constants

    # Build the zero-padded single-channel tile in VMEM scratch.
    # (Zero every step: with "parallel" sharding each core must establish its
    # own zero border; the fill is a handful of vector stores.)
    xp_scr[...] = jnp.zeros_like(xp_scr)
    x0 = x_ref[:, 0, :, :]                 # (BT, H, W) original channel
    xp_scr[:, P:P + H, P:P + W] = x0

    def win(di, dj, ks):
        # window shifted by (di, dj) for a ks x ks cross-correlation with pad ks//2,
        # sliced directly off the scratch ref (keeps the padded tile out of vregs).
        off = P - ks // 2
        return xp_scr[:, off + di: off + di + H, off + dj: off + dj + W]

    zero = jnp.zeros((BT, H, W), jnp.float32)
    s = zero        # running sum            -> mean filter
    s2 = zero       # running sum of squares -> std filter
    gauss = zero    # gaussian filter
    lap = zero      # laplacian
    gx = zero       # sobel x
    gy = zero       # sobel y

    fused_edges = (ksize == 3)  # kxk and 3x3 filters share identical window slices

    # Single fused pass over the k x k windows.
    for di in range(ksize):
        for dj in range(ksize):
            w = win(di, dj, ksize)
            s = s + w
            s2 = s2 + w * w
            gauss = gauss + w * float(gk[di, dj])
            if fused_edges:
                lw = float(_LAPLACIAN[di, dj])
                sx = float(_SOBEL_X[di, dj])
                sy = float(_SOBEL_Y[di, dj])
                if lw != 0.0:
                    lap = lap + w * lw
                if sx != 0.0:
                    gx = gx + w * sx
                if sy != 0.0:
                    gy = gy + w * sy

    if not fused_edges:
        # 3x3 edge filters need their own (pad=1) windows when ksize != 3.
        for di in range(3):
            for dj in range(3):
                w = win(di, dj, 3)
                lw = float(_LAPLACIAN[di, dj])
                sx = float(_SOBEL_X[di, dj])
                sy = float(_SOBEL_Y[di, dj])
                if lw != 0.0:
                    lap = lap + w * lw
                if sx != 0.0:
                    gx = gx + w * sx
                if sy != 0.0:
                    gy = gy + w * sy

    mean_f = s * (1.0 / k2)
    var = jnp.maximum(s2 * (1.0 / k2) - mean_f * mean_f, 0.0)  # clamp roundoff
    std_f = jnp.sqrt(var + 1e-8)
    grad_mag = jnp.sqrt(gx * gx + gy * gy + 1e-8)

    feats = (x0, mean_f, std_f, lap, grad_mag, gauss)

    # "linear" 1x1 conv: out[c] = bias[c] + sum_f W[c, f] * feats[f]
    # (6-wide contraction with SMEM scalar weights -> VPU FMAs; MXU not useful here)
    for c in range(num_classes):
        acc = feats[0] * w_ref[c * 6 + 0]
        for f in range(1, 6):
            acc = acc + feats[f] * w_ref[c * 6 + f]
        out_ref[:, c, :, :] = acc + b_ref[c]


# ------------------------------------- wrapper --------------------------------------

def _pick_batch_tile(B: int, cap: int = 8) -> int:
    """Largest divisor of B that is <= cap (batch elements per grid step)."""
    bt = 1
    for d in range(1, min(B, cap) + 1):
        if B % d == 0:
            bt = d
    return bt


def linear_regression_forward(x, weight, bias, kernel_size: int = 3):
    """x: (B, C, H, W) f32 NCHW; weight: (num_classes, 6, 1, 1); bias: (num_classes,)."""
    B, C, H, W = x.shape
    num_classes = weight.shape[0]
    P = max(kernel_size // 2, 1)          # halo covers both kxk and 3x3 filters
    BT = _pick_batch_tile(B)

    x = x.astype(jnp.float32)
    w_flat = weight.reshape(num_classes * 6).astype(jnp.float32)  # 1D -> tiny SMEM footprint
    b_flat = bias.astype(jnp.float32)

    kernel = functools.partial(
        _lr_kernel, H=H, W=W, ksize=kernel_size, P=P, num_classes=num_classes
    )

    return pl.pallas_call(
        kernel,
        out_shape=jax.ShapeDtypeStruct((B, num_classes, H, W), jnp.float32),
        grid=(B // BT,),
        in_specs=[
            pl.BlockSpec(memory_space=pltpu.MemorySpace.SMEM),   # weights (scalars)
            pl.BlockSpec(memory_space=pltpu.MemorySpace.SMEM),   # bias (scalars)
            # Only channel 0 is ever DMA'd from HBM (channel block index 0).
            pl.BlockSpec((BT, 1, H, W), lambda b: (b, 0, 0, 0)),
        ],
        out_specs=pl.BlockSpec((BT, num_classes, H, W), lambda b: (b, 0, 0, 0)),
        scratch_shapes=[pltpu.VMEM((BT, H + 2 * P, W + 2 * P), jnp.float32)],
        compiler_params=pltpu.CompilerParams(dimension_semantics=("parallel",)),
    )(w_flat, b_flat, x)


# ----------------------------- pure-JAX reference (check) ---------------------------

def _reference(x, weight, bias, kernel_size: int = 3):
    B, C, H, W = x.shape
    num_classes = weight.shape[0]
    P = max(kernel_size // 2, 1)
    gk = _gaussian_kernel_np(kernel_size)
    k2 = kernel_size * kernel_size

    x0 = x[:, 0].astype(jnp.float32)
    xp = jnp.pad(x0, ((0, 0), (P, P), (P, P)))

    def win(di, dj, ks):
        off = P - ks // 2
        return xp[:, off + di: off + di + H, off + dj: off + dj + W]

    mean_f = sum(win(di, dj, kernel_size) for di in range(kernel_size)
                 for dj in range(kernel_size)) / k2
    gauss_f = sum(float(gk[di, dj]) * win(di, dj, kernel_size)
                  for di in range(kernel_size) for dj in range(kernel_size))
    var = sum((win(di, dj, kernel_size) - mean_f) ** 2
              for di in range(kernel_size) for dj in range(kernel_size)) / k2
    std_f = jnp.sqrt(var + 1e-8)
    lap = sum(float(_LAPLACIAN[di, dj]) * win(di, dj, 3) for di in range(3) for dj in range(3))
    gx = sum(float(_SOBEL_X[di, dj]) * win(di, dj, 3) for di in range(3) for dj in range(3))
    gy = sum(float(_SOBEL_Y[di, dj]) * win(di, dj, 3) for di in range(3) for dj in range(3))
    gm = jnp.sqrt(gx ** 2 + gy ** 2 + 1e-8)

    feats = jnp.stack([x0, mean_f, std_f, lap, gm, gauss_f], axis=1)   # (B,6,H,W)
    w2 = weight.reshape(num_classes, 6)
    return jnp.einsum("cf,bfhw->bchw", w2, feats) + bias[None, :, None, None]


# --------------------------------------- main ---------------------------------------

if __name__ == "__main__":
    key = jax.random.PRNGKey(0)
    kx, kw = jax.random.split(key)

    B, C, H, W = 2, 4, 16, 16
    num_classes = 3
    kernel_size = 3

    x = jax.random.normal(kx, (B, C, H, W), dtype=jnp.float32)

    # Deterministic parameter init mirroring the module __init__:
    #   linear = Conv2d(6, num_classes, 1, bias=True), xavier_uniform weight, zero bias.
    fan_in, fan_out = 6, num_classes
    bound = float(np.sqrt(6.0 / (fan_in + fan_out)))
    weight = jax.random.uniform(kw, (num_classes, 6, 1, 1), jnp.float32, -bound, bound)
    bias = jnp.zeros((num_classes,), jnp.float32)
    # NOTE: feature_transform / classifier convs exist in __init__ but are unused in forward.

    out = jax.block_until_ready(linear_regression_forward(x, weight, bias, kernel_size))
    assert out.shape == (B, num_classes, H, W) and out.dtype == jnp.float32

    ref = jax.block_until_ready(_reference(x, weight, bias, kernel_size))
    np.testing.assert_allclose(np.asarray(out), np.asarray(ref), rtol=1e-4, atol=1e-4)

    print("KERNEL_OK")
</pallas_src>

<mosaic_0001>
module attributes {stable_mosaic.version = 11 : i64} {
  func.func @_lr_kernel(%arg0: i32, %arg1: memref<18xf32, #tpu.memory_space<smem>>, %arg2: memref<3xf32, #tpu.memory_space<smem>>, %arg3: memref<2x1x16x16xf32, #tpu.memory_space<vmem>>, %arg4: memref<2x3x16x16xf32, #tpu.memory_space<vmem>>, %arg5: memref<2x18x18xf32, #tpu.memory_space<vmem>>) attributes {dimension_semantics = [#tpu.dimension_semantics<parallel>], iteration_bounds = array<i64: 1>, scalar_prefetch = 0 : i64, scratch_operands = 1 : i64, tpu.core_type = #tpu.core_type<tc>, window_params = [{transform_indices = @transform_0, window_bounds = array<i64: 18>}, {transform_indices = @transform_1, window_bounds = array<i64: 3>}, {transform_indices = @transform_2, window_bounds = array<i64: 2, 1, 16, 16>}, {transform_indices = @transform_3, window_bounds = array<i64: 2, 3, 16, 16>}]} {
    %cst = arith.constant 0.000000e+00 : f32
    %0 = vector.broadcast %cst : f32 to vector<2x18x18xf32>
    %c0 = arith.constant 0 : index
    %c0_0 = arith.constant 0 : index
    %c0_1 = arith.constant 0 : index
    %1 = vector.load %arg5[%c0, %c0_0, %c0_1] : memref<2x18x18xf32, #tpu.memory_space<vmem>>, vector<2x18x18xf32>
    tpu.vector_store %arg5[%c0, %c0_0, %c0_1], %0 {strides = array<i32>} : memref<2x18x18xf32, #tpu.memory_space<vmem>>, vector<2x18x18xf32>,
    %c0_2 = arith.constant 0 : index
    %c0_3 = arith.constant 0 : index
    %c0_4 = arith.constant 0 : index
    %c0_5 = arith.constant 0 : index
    %2 = vector.load %arg3[%c0_2, %c0_3, %c0_4, %c0_5] : memref<2x1x16x16xf32, #tpu.memory_space<vmem>>, vector<2x1x16x16xf32>
    %3 = vector.shape_cast %2 : vector<2x1x16x16xf32> to vector<2x16x16xf32>
    %c0_6 = arith.constant 0 : index
    %c1 = arith.constant 1 : index
    %c1_7 = arith.constant 1 : index
    %4 = vector.load %arg5[%c0_6, %c1, %c1_7] : memref<2x18x18xf32, #tpu.memory_space<vmem>>, vector<2x16x16xf32>
    tpu.vector_store %arg5[%c0_6, %c1, %c1_7], %3 {strides = array<i32>} : memref<2x18x18xf32, #tpu.memory_space<vmem>>, vector<2x16x16xf32>,
    %cst_8 = arith.constant 0.000000e+00 : f32
    %5 = vector.broadcast %cst_8 : f32 to vector<2x16x16xf32>
    %c0_9 = arith.constant 0 : index
    %c0_10 = arith.constant 0 : index
    %c0_11 = arith.constant 0 : index
    %6 = vector.load %arg5[%c0_9, %c0_10, %c0_11] : memref<2x18x18xf32, #tpu.memory_space<vmem>>, vector<2x16x16xf32>
    %7 = arith.addf %5, %6 : vector<2x16x16xf32>
    %8 = arith.mulf %6, %6 : vector<2x16x16xf32>
    %9 = arith.addf %5, %8 : vector<2x16x16xf32>
    %cst_12 = arith.constant 0.0751136094 : f32
    %10 = vector.broadcast %cst_12 : f32 to vector<2x16x16xf32>
    %11 = arith.mulf %6, %10 : vector<2x16x16xf32>
    %12 = arith.addf %5, %11 : vector<2x16x16xf32>
    %cst_13 = arith.constant -1.000000e+00 : f32
    %13 = vector.broadcast %cst_13 : f32 to vector<2x16x16xf32>
    %14 = arith.mulf %6, %13 : vector<2x16x16xf32>
    %15 = arith.addf %5, %14 : vector<2x16x16xf32>
    %cst_14 = arith.constant -1.000000e+00 : f32
    %16 = vector.broadcast %cst_14 : f32 to vector<2x16x16xf32>
    %17 = arith.mulf %6, %16 : vector<2x16x16xf32>
    %18 = arith.addf %5, %17 : vector<2x16x16xf32>
    %c0_15 = arith.constant 0 : index
    %c0_16 = arith.constant 0 : index
    %c1_17 = arith.constant 1 : index
    %19 = vector.load %arg5[%c0_15, %c0_16, %c1_17] : memref<2x18x18xf32, #tpu.memory_space<vmem>>, vector<2x16x16xf32>
    %20 = arith.addf %7, %19 : vector<2x16x16xf32>
    %21 = arith.mulf %19, %19 : vector<2x16x16xf32>
    %22 = arith.addf %9, %21 : vector<2x16x16xf32>
    %cst_18 = arith.constant 0.123841412 : f32
    %23 = vector.broadcast %cst_18 : f32 to vector<2x16x16xf32>
    %24 = arith.mulf %19, %23 : vector<2x16x16xf32>
    %25 = arith.addf %12, %24 : vector<2x16x16xf32>
    %cst_19 = arith.constant 1.000000e+00 : f32
    %26 = vector.broadcast %cst_19 : f32 to vector<2x16x16xf32>
    %27 = arith.mulf %19, %26 : vector<2x16x16xf32>
    %28 = arith.addf %5, %27 : vector<2x16x16xf32>
    %cst_20 = arith.constant -2.000000e+00 : f32
    %29 = vector.broadcast %cst_20 : f32 to vector<2x16x16xf32>
    %30 = arith.mulf %19, %29 : vector<2x16x16xf32>
    %31 = arith.addf %18, %30 : vector<2x16x16xf32>
    %c0_21 = arith.constant 0 : index
    %c0_22 = arith.constant 0 : index
    %c2 = arith.constant 2 : index
    %32 = vector.load %arg5[%c0_21, %c0_22, %c2] : memref<2x18x18xf32, #tpu.memory_space<vmem>>, vector<2x16x16xf32>
    %33 = arith.addf %20, %32 : vector<2x16x16xf32>
    %34 = arith.mulf %32, %32 : vector<2x16x16xf32>
    %35 = arith.addf %22, %34 : vector<2x16x16xf32>
    %cst_23 = arith.constant 0.0751136094 : f32
    %36 = vector.broadcast %cst_23 : f32 to vector<2x16x16xf32>
    %37 = arith.mulf %32, %36 : vector<2x16x16xf32>
    %38 = arith.addf %25, %37 : vector<2x16x16xf32>
    %cst_24 = arith.constant 1.000000e+00 : f32
    %39 = vector.broadcast %cst_24 : f32 to vector<2x16x16xf32>
    %40 = arith.mulf %32, %39 : vector<2x16x16xf32>
    %41 = arith.addf %15, %40 : vector<2x16x16xf32>
    %cst_25 = arith.constant -1.000000e+00 : f32
    %42 = vector.broadcast %cst_25 : f32 to vector<2x16x16xf32>
    %43 = arith.mulf %32, %42 : vector<2x16x16xf32>
    %44 = arith.addf %31, %43 : vector<2x16x16xf32>
    %c0_26 = arith.constant 0 : index
    %c1_27 = arith.constant 1 : index
    %c0_28 = arith.constant 0 : index
    %45 = vector.load %arg5[%c0_26, %c1_27, %c0_28] : memref<2x18x18xf32, #tpu.memory_space<vmem>>, vector<2x16x16xf32>
    %46 = arith.addf %33, %45 : vector<2x16x16xf32>
    %47 = arith.mulf %45, %45 : vector<2x16x16xf32>
    %48 = arith.addf %35, %47 : vector<2x16x16xf32>
    %cst_29 = arith.constant 0.123841412 : f32
    %49 = vector.broadcast %cst_29 : f32 to vector<2x16x16xf32>
    %50 = arith.mulf %45, %49 : vector<2x16x16xf32>
    %51 = arith.addf %38, %50 : vector<2x16x16xf32>
    %cst_30 = arith.constant 1.000000e+00 : f32
    %52 = vector.broadcast %cst_30 : f32 to vector<2x16x16xf32>
    %53 = arith.mulf %45, %52 : vector<2x16x16xf32>
    %54 = arith.addf %28, %53 : vector<2x16x16xf32>
    %cst_31 = arith.constant -2.000000e+00 : f32
    %55 = vector.broadcast %cst_31 : f32 to vector<2x16x16xf32>
    %56 = arith.mulf %45, %55 : vector<2x16x16xf32>
    %57 = arith.addf %41, %56 : vector<2x16x16xf32>
    %c0_32 = arith.constant 0 : index
    %c1_33 = arith.constant 1 : index
    %c1_34 = arith.constant 1 : index
    %58 = vector.load %arg5[%c0_32, %c1_33, %c1_34] : memref<2x18x18xf32, #tpu.memory_space<vmem>>, vector<2x16x16xf32>
    %59 = arith.addf %46, %58 : vector<2x16x16xf32>
    %60 = arith.mulf %58, %58 : vector<2x16x16xf32>
    %61 = arith.addf %48, %60 : vector<2x16x16xf32>
    %cst_35 = arith.constant 0.204179958 : f32
    %62 = vector.broadcast %cst_35 : f32 to vector<2x16x16xf32>
    %63 = arith.mulf %58, %62 : vector<2x16x16xf32>
    %64 = arith.addf %51, %63 : vector<2x16x16xf32>
    %cst_36 = arith.constant -4.000000e+00 : f32
    %65 = vector.broadcast %cst_36 : f32 to vector<2x16x16xf32>
    %66 = arith.mulf %58, %65 : vector<2x16x16xf32>
    %67 = arith.addf %54, %66 : vector<2x16x16xf32>
    %c0_37 = arith.constant 0 : index
    %c1_38 = arith.constant 1 : index
    %c2_39 = arith.constant 2 : index
    %68 = vector.load %arg5[%c0_37, %c1_38, %c2_39] : memref<2x18x18xf32, #tpu.memory_space<vmem>>, vector<2x16x16xf32>
    %69 = arith.addf %59, %68 : vector<2x16x16xf32>
    %70 = arith.mulf %68, %68 : vector<2x16x16xf32>
    %71 = arith.addf %61, %70 : vector<2x16x16xf32>
    %cst_40 = arith.constant 0.123841412 : f32
    %72 = vector.broadcast %cst_40 : f32 to vector<2x16x16xf32>
    %73 = arith.mulf %68, %72 : vector<2x16x16xf32>
    %74 = arith.addf %64, %73 : vector<2x16x16xf32>
    %cst_41 = arith.constant 1.000000e+00 : f32
    %75 = vector.broadcast %cst_41 : f32 to vector<2x16x16xf32>
    %76 = arith.mulf %68, %75 : vector<2x16x16xf32>
    %77 = arith.addf %67, %76 : vector<2x16x16xf32>
    %cst_42 = arith.constant 2.000000e+00 : f32
    %78 = vector.broadcast %cst_42 : f32 to vector<2x16x16xf32>
    %79 = arith.mulf %68, %78 : vector<2x16x16xf32>
    %80 = arith.addf %57, %79 : vector<2x16x16xf32>
    %c0_43 = arith.constant 0 : index
    %c2_44 = arith.constant 2 : index
    %c0_45 = arith.constant 0 : index
    %81 = vector.load %arg5[%c0_43, %c2_44, %c0_45] : memref<2x18x18xf32, #tpu.memory_space<vmem>>, vector<2x16x16xf32>
    %82 = arith.addf %69, %81 : vector<2x16x16xf32>
    %83 = arith.mulf %81, %81 : vector<2x16x16xf32>
    %84 = arith.addf %71, %83 : vector<2x16x16xf32>
    %cst_46 = arith.constant 0.0751136094 : f32
    %85 = vector.broadcast %cst_46 : f32 to vector<2x16x16xf32>
    %86 = arith.mulf %81, %85 : vector<2x16x16xf32>
    %87 = arith.addf %74, %86 : vector<2x16x16xf32>
    %cst_47 = arith.constant -1.000000e+00 : f32
    %88 = vector.broadcast %cst_47 : f32 to vector<2x16x16xf32>
    %89 = arith.mulf %81, %88 : vector<2x16x16xf32>
    %90 = arith.addf %80, %89 : vector<2x16x16xf32>
    %cst_48 = arith.constant 1.000000e+00 : f32
    %91 = vector.broadcast %cst_48 : f32 to vector<2x16x16xf32>
    %92 = arith.mulf %81, %91 : vector<2x16x16xf32>
    %93 = arith.addf %44, %92 : vector<2x16x16xf32>
    %c0_49 = arith.constant 0 : index
    %c2_50 = arith.constant 2 : index
    %c1_51 = arith.constant 1 : index
    %94 = vector.load %arg5[%c0_49, %c2_50, %c1_51] : memref<2x18x18xf32, #tpu.memory_space<vmem>>, vector<2x16x16xf32>
    %95 = arith.addf %82, %94 : vector<2x16x16xf32>
    %96 = arith.mulf %94, %94 : vector<2x16x16xf32>
    %97 = arith.addf %84, %96 : vector<2x16x16xf32>
    %cst_52 = arith.constant 0.123841412 : f32
    %98 = vector.broadcast %cst_52 : f32 to vector<2x16x16xf32>
    %99 = arith.mulf %94, %98 : vector<2x16x16xf32>
    %100 = arith.addf %87, %99 : vector<2x16x16xf32>
    %cst_53 = arith.constant 1.000000e+00 : f32
    %101 = vector.broadcast %cst_53 : f32 to vector<2x16x16xf32>
    %102 = arith.mulf %94, %101 : vector<2x16x16xf32>
    %103 = arith.addf %77, %102 : vector<2x16x16xf32>
    %cst_54 = arith.constant 2.000000e+00 : f32
    %104 = vector.broadcast %cst_54 : f32 to vector<2x16x16xf32>
    %105 = arith.mulf %94, %104 : vector<2x16x16xf32>
    %106 = arith.addf %93, %105 : vector<2x16x16xf32>
    %c0_55 = arith.constant 0 : index
    %c2_56 = arith.constant 2 : index
    %c2_57 = arith.constant 2 : index
    %107 = vector.load %arg5[%c0_55, %c2_56, %c2_57] : memref<2x18x18xf32, #tpu.memory_space<vmem>>, vector<2x16x16xf32>
    %108 = arith.addf %95, %107 : vector<2x16x16xf32>
    %109 = arith.mulf %107, %107 : vector<2x16x16xf32>
    %110 = arith.addf %97, %109 : vector<2x16x16xf32>
    %cst_58 = arith.constant 0.0751136094 : f32
    %111 = vector.broadcast %cst_58 : f32 to vector<2x16x16xf32>
    %112 = arith.mulf %107, %111 : vector<2x16x16xf32>
    %113 = arith.addf %100, %112 : vector<2x16x16xf32>
    %cst_59 = arith.constant 1.000000e+00 : f32
    %114 = vector.broadcast %cst_59 : f32 to vector<2x16x16xf32>
    %115 = arith.mulf %107, %114 : vector<2x16x16xf32>
    %116 = arith.addf %90, %115 : vector<2x16x16xf32>
    %cst_60 = arith.constant 1.000000e+00 : f32
    %117 = vector.broadcast %cst_60 : f32 to vector<2x16x16xf32>
    %118 = arith.mulf %107, %117 : vector<2x16x16xf32>
    %119 = arith.addf %106, %118 : vector<2x16x16xf32>
    %cst_61 = arith.constant 0.111111112 : f32
    %120 = vector.broadcast %cst_61 : f32 to vector<2x16x16xf32>
    %121 = arith.mulf %108, %120 : vector<2x16x16xf32>
    %cst_62 = arith.constant 0.111111112 : f32
    %122 = vector.broadcast %cst_62 : f32 to vector<2x16x16xf32>
    %123 = arith.mulf %110, %122 : vector<2x16x16xf32>
    %124 = arith.mulf %121, %121 : vector<2x16x16xf32>
    %125 = arith.subf %123, %124 : vector<2x16x16xf32>
    %cst_63 = arith.constant 0.000000e+00 : f32
    %126 = vector.broadcast %cst_63 : f32 to vector<2x16x16xf32>
    %127 = arith.maximumf %125, %126 : vector<2x16x16xf32>
    %cst_64 = arith.constant 9.99999993E-9 : f32
    %128 = vector.broadcast %cst_64 : f32 to vector<2x16x16xf32>
    %129 = arith.addf %127, %128 : vector<2x16x16xf32>
    %130 = math.sqrt %129 : vector<2x16x16xf32>
    %131 = arith.mulf %116, %116 : vector<2x16x16xf32>
    %132 = arith.mulf %119, %119 : vector<2x16x16xf32>
    %133 = arith.addf %131, %132 : vector<2x16x16xf32>
    %cst_65 = arith.constant 9.99999993E-9 : f32
    %134 = vector.broadcast %cst_65 : f32 to vector<2x16x16xf32>
    %135 = arith.addf %133, %134 : vector<2x16x16xf32>
    %136 = math.sqrt %135 : vector<2x16x16xf32>
    %c0_66 = arith.constant 0 : index
    %137 = memref.load %arg1[%c0_66] : memref<18xf32, #tpu.memory_space<smem>>
    %138 = vector.broadcast %137 : f32 to vector<2x16x16xf32>
    %139 = arith.mulf %3, %138 : vector<2x16x16xf32>
    %c1_67 = arith.constant 1 : index
    %140 = memref.load %arg1[%c1_67] : memref<18xf32, #tpu.memory_space<smem>>
    %141 = vector.broadcast %140 : f32 to vector<2x16x16xf32>
    %142 = arith.mulf %121, %141 : vector<2x16x16xf32>
    %143 = arith.addf %139, %142 : vector<2x16x16xf32>
    %c2_68 = arith.constant 2 : index
    %144 = memref.load %arg1[%c2_68] : memref<18xf32, #tpu.memory_space<smem>>
    %145 = vector.broadcast %144 : f32 to vector<2x16x16xf32>
    %146 = arith.mulf %130, %145 : vector<2x16x16xf32>
    %147 = arith.addf %143, %146 : vector<2x16x16xf32>
    %c3 = arith.constant 3 : index
    %148 = memref.load %arg1[%c3] : memref<18xf32, #tpu.memory_space<smem>>
    %149 = vector.broadcast %148 : f32 to vector<2x16x16xf32>
    %150 = arith.mulf %103, %149 : vector<2x16x16xf32>
    %151 = arith.addf %147, %150 : vector<2x16x16xf32>
    %c4 = arith.constant 4 : index
    %152 = memref.load %arg1[%c4] : memref<18xf32, #tpu.memory_space<smem>>
    %153 = vector.broadcast %152 : f32 to vector<2x16x16xf32>
    %154 = arith.mulf %136, %153 : vector<2x16x16xf32>
    %155 = arith.addf %151, %154 : vector<2x16x16xf32>
    %c5 = arith.constant 5 : index
    %156 = memref.load %arg1[%c5] : memref<18xf32, #tpu.memory_space<smem>>
    %157 = vector.broadcast %156 : f32 to vector<2x16x16xf32>
    %158 = arith.mulf %113, %157 : vector<2x16x16xf32>
    %159 = arith.addf %155, %158 : vector<2x16x16xf32>
    %c0_69 = arith.constant 0 : index
    %160 = memref.load %arg2[%c0_69] : memref<3xf32, #tpu.memory_space<smem>>
    %161 = vector.broadcast %160 : f32 to vector<2x16x16xf32>
    %162 = arith.addf %159, %161 : vector<2x16x16xf32>
    %c0_70 = arith.constant 0 : index
    %c0_71 = arith.constant 0 : index
    %c0_72 = arith.constant 0 : index
    %c0_73 = arith.constant 0 : index
    %163 = vector.load %arg4[%c0_70, %c0_71, %c0_72, %c0_73] : memref<2x3x16x16xf32, #tpu.memory_space<vmem>>, vector<2x1x16x16xf32>
    %164 = vector.shape_cast %163 : vector<2x1x16x16xf32> to vector<2x16x16xf32>
    %165 = vector.shape_cast %162 : vector<2x16x16xf32> to vector<2x1x16x16xf32>
    tpu.vector_store %arg4[%c0_70, %c0_71, %c0_72, %c0_73], %165 {strides = array<i32>} : memref<2x3x16x16xf32, #tpu.memory_space<vmem>>, vector<2x1x16x16xf32>,
    %c6 = arith.constant 6 : index
    %166 = memref.load %arg1[%c6] : memref<18xf32, #tpu.memory_space<smem>>
    %167 = vector.broadcast %166 : f32 to vector<2x16x16xf32>
    %168 = arith.mulf %3, %167 : vector<2x16x16xf32>
    %c7 = arith.constant 7 : index
    %169 = memref.load %arg1[%c7] : memref<18xf32, #tpu.memory_space<smem>>
    %170 = vector.broadcast %169 : f32 to vector<2x16x16xf32>
    %171 = arith.mulf %121, %170 : vector<2x16x16xf32>
    %172 = arith.addf %168, %171 : vector<2x16x16xf32>
    %c8 = arith.constant 8 : index
    %173 = memref.load %arg1[%c8] : memref<18xf32, #tpu.memory_space<smem>>
    %174 = vector.broadcast %173 : f32 to vector<2x16x16xf32>
    %175 = arith.mulf %130, %174 : vector<2x16x16xf32>
    %176 = arith.addf %172, %175 : vector<2x16x16xf32>
    %c9 = arith.constant 9 : index
    %177 = memref.load %arg1[%c9] : memref<18xf32, #tpu.memory_space<smem>>
    %178 = vector.broadcast %177 : f32 to vector<2x16x16xf32>
    %179 = arith.mulf %103, %178 : vector<2x16x16xf32>
    %180 = arith.addf %176, %179 : vector<2x16x16xf32>
    %c10 = arith.constant 10 : index
    %181 = memref.load %arg1[%c10] : memref<18xf32, #tpu.memory_space<smem>>
    %182 = vector.broadcast %181 : f32 to vector<2x16x16xf32>
    %183 = arith.mulf %136, %182 : vector<2x16x16xf32>
    %184 = arith.addf %180, %183 : vector<2x16x16xf32>
    %c11 = arith.constant 11 : index
    %185 = memref.load %arg1[%c11] : memref<18xf32, #tpu.memory_space<smem>>
    %186 = vector.broadcast %185 : f32 to vector<2x16x16xf32>
    %187 = arith.mulf %113, %186 : vector<2x16x16xf32>
    %188 = arith.addf %184, %187 : vector<2x16x16xf32>
    %c1_74 = arith.constant 1 : index
    %189 = memref.load %arg2[%c1_74] : memref<3xf32, #tpu.memory_space<smem>>
    %190 = vector.broadcast %189 : f32 to vector<2x16x16xf32>
    %191 = arith.addf %188, %190 : vector<2x16x16xf32>
    %c0_75 = arith.constant 0 : index
    %c1_76 = arith.constant 1 : index
    %c0_77 = arith.constant 0 : index
    %c0_78 = arith.constant 0 : index
    %192 = vector.load %arg4[%c0_75, %c1_76, %c0_77, %c0_78] : memref<2x3x16x16xf32, #tpu.memory_space<vmem>>, vector<2x1x16x16xf32>
    %193 = vector.shape_cast %192 : vector<2x1x16x16xf32> to vector<2x16x16xf32>
    %194 = vector.shape_cast %191 : vector<2x16x16xf32> to vector<2x1x16x16xf32>
    tpu.vector_store %arg4[%c0_75, %c1_76, %c0_77, %c0_78], %194 {strides = array<i32>} : memref<2x3x16x16xf32, #tpu.memory_space<vmem>>, vector<2x1x16x16xf32>,
    %c12 = arith.constant 12 : index
    %195 = memref.load %arg1[%c12] : memref<18xf32, #tpu.memory_space<smem>>
    %196 = vector.broadcast %195 : f32 to vector<2x16x16xf32>
    %197 = arith.mulf %3, %196 : vector<2x16x16xf32>
    %c13 = arith.constant 13 : index
    %198 = memref.load %arg1[%c13] : memref<18xf32, #tpu.memory_space<smem>>
    %199 = vector.broadcast %198 : f32 to vector<2x16x16xf32>
    %200 = arith.mulf %121, %199 : vector<2x16x16xf32>
    %201 = arith.addf %197, %200 : vector<2x16x16xf32>
    %c14 = arith.constant 14 : index
    %202 = memref.load %arg1[%c14] : memref<18xf32, #tpu.memory_space<smem>>
    %203 = vector.broadcast %202 : f32 to vector<2x16x16xf32>
    %204 = arith.mulf %130, %203 : vector<2x16x16xf32>
    %205 = arith.addf %201, %204 : vector<2x16x16xf32>
    %c15 = arith.constant 15 : index
    %206 = memref.load %arg1[%c15] : memref<18xf32, #tpu.memory_space<smem>>
    %207 = vector.broadcast %206 : f32 to vector<2x16x16xf32>
    %208 = arith.mulf %103, %207 : vector<2x16x16xf32>
    %209 = arith.addf %205, %208 : vector<2x16x16xf32>
    %c16 = arith.constant 16 : index
    %210 = memref.load %arg1[%c16] : memref<18xf32, #tpu.memory_space<smem>>
    %211 = vector.broadcast %210 : f32 to vector<2x16x16xf32>
    %212 = arith.mulf %136, %211 : vector<2x16x16xf32>
    %213 = arith.addf %209, %212 : vector<2x16x16xf32>
    %c17 = arith.constant 17 : index
    %214 = memref.load %arg1[%c17] : memref<18xf32, #tpu.memory_space<smem>>
    %215 = vector.broadcast %214 : f32 to vector<2x16x16xf32>
    %216 = arith.mulf %113, %215 : vector<2x16x16xf32>
    %217 = arith.addf %213, %216 : vector<2x16x16xf32>
    %c2_79 = arith.constant 2 : index
    %218 = memref.load %arg2[%c2_79] : memref<3xf32, #tpu.memory_space<smem>>
    %219 = vector.broadcast %218 : f32 to vector<2x16x16xf32>
    %220 = arith.addf %217, %219 : vector<2x16x16xf32>
    %c0_80 = arith.constant 0 : index
    %c2_81 = arith.constant 2 : index
    %c0_82 = arith.constant 0 : index
    %c0_83 = arith.constant 0 : index
    %221 = vector.load %arg4[%c0_80, %c2_81, %c0_82, %c0_83] : memref<2x3x16x16xf32, #tpu.memory_space<vmem>>, vector<2x1x16x16xf32>
    %222 = vector.shape_cast %221 : vector<2x1x16x16xf32> to vector<2x16x16xf32>
    %223 = vector.shape_cast %220 : vector<2x16x16xf32> to vector<2x1x16x16xf32>
    tpu.vector_store %arg4[%c0_80, %c2_81, %c0_82, %c0_83], %223 {strides = array<i32>} : memref<2x3x16x16xf32, #tpu.memory_space<vmem>>, vector<2x1x16x16xf32>,
    return
  }
  func.func @transform_0(%arg0: i32) -> i32 {
    %c0_i32 = arith.constant 0 : i32
    %c0_i32_0 = arith.constant 0 : i32
    return %c0_i32 : i32
  }
  func.func @transform_1(%arg0: i32) -> i32 {
    %c0_i32 = arith.constant 0 : i32
    %c0_i32_0 = arith.constant 0 : i32
    return %c0_i32 : i32
  }
  func.func @transform_2(%arg0: i32) -> (i32, i32, i32, i32) {
    %c0_i32 = arith.constant 0 : i32
    %c0_i32_0 = arith.constant 0 : i32
    %c0_i32_1 = arith.constant 0 : i32
    %c0_i32_2 = arith.constant 0 : i32
    return %arg0, %c0_i32, %c0_i32_0, %c0_i32_1 : i32, i32, i32, i32
  }
  func.func @transform_3(%arg0: i32) -> (i32, i32, i32, i32) {
    %c0_i32 = arith.constant 0 : i32
    %c0_i32_0 = arith.constant 0 : i32
    %c0_i32_1 = arith.constant 0 : i32
    %c0_i32_2 = arith.constant 0 : i32
    return %arg0, %c0_i32, %c0_i32_0, %c0_i32_1 : i32, i32, i32, i32
  }
}

</mosaic_0001>

<bundles_post_ra>
// kernel: tpu_custom_call.1
= control target key start
LH: loop header
LB: loop body
LE: loop exit
PB: predicated region body
PF: predicated region fallthrough
CT: control target
= control target key end

     0   :  { %8 = vsyncpa [#allocation6], 0  ;;  %s2208_s0 = inlined_call_operand.hbm [shape: f32[18], index: 0, kind: input, shape index: {}]   ;;  %s2209_s1 = inlined_call_operand.vmem [shape: f32[3], index: 1, kind: input, shape index: {}]   ;;  %s2210_s2 = inlined_call_operand.hbm [shape: f32[2,4,16,16], index: 2, kind: input, shape index: {}]   ;;  %s2211_s3 = inlined_call_operand.hbm [shape: f32[2,3,16,16], index: 3, kind: output, shape index: {}]  }
   0x1   :  { %9 = vsyncpa [#allocation7], 0 }
   0x2   :  { %10 = vsyncpa [#allocation4], 0 }
   0x3   :  { %11 = vsyncpa [#allocation5], 0  ;;  %s26_s14 = sshll.u32 %s2209_s1, 4  ;;  %s1112_s17 = scalar_lea.hbm %s2208_s0, 16  ;;  %s27_s14 = int_to_ptr.vmem [resolvable:$true] %s26_s14 }
   0x4   :  { %p1113_p0 = scmp.ne.s32.totalorder %s2208_s0, %s1112_s17  ;;  %p1116_p1 = scmp.lt.u32.totalorder %s1112_s17, %s2208_s0 }
   0x6   :  { %p1118_p2 = pnand %p1116_p1, %p1113_p0 }
   0x8   :  { %1121 = shalt.err (!%p1118_p2)
}
   0x9   :  { %s1164_s22 = smov [#allocation3]   ;;  %s1122_s1 = scalar_lea.vmem %s27_s14, 16 }
   0xa   :  { %19 = dma.hbm_to_smem %s2208_s0, 16, %s1164_s22, [#allocation6]  }
   0xb   :  { %p1123_p3 = scmp.ne.s32.totalorder %s27_s14, %s1122_s1  ;;  %p1127_p4 = scmp.lt.s32.totalorder %s27_s14, %s27_s14 }
   0xc   :  { %p1128_p5 = scmp.lt.s32.totalorder %s1122_s1, %s1122_s1 }
   0xe   :  { %p1129_p6 = por %p1128_p5, %p1127_p4 }
  0x10   :  { %p1130_p7 = pnand %p1129_p6, %p1123_p3 }
  0x12   :  { %1133 = shalt.err (!%p1130_p7)
}
  0x13   :  { %s1165_s25 = smov [#allocation8]  }
  0x14   :  { %29 = dma.vmem_to_smem %s27_s14, 16, %s1165_s25, [#allocation7]  }
  0x15   :  { %s39_s26 = sld [smem:[#allocation0]]   ;;  %s1166_s27 = smov [#allocation9]  }
  0x16   :  { %s47_s28 = sshll.u32 %s1166_s27, 4  ;;  %s1167_s29 = smov 1024   ;;  %s48_s28 = int_to_ptr.vmem [resolvable:$true] %s47_s28 }
  0x17   :  { %54 = sst [smem:[#allocation12]] %s1167_s29  ;;  %s1168_s30 = smov 256  }
  0x18   :  { %56 = sst [smem:[#allocation12 + $0x1]] %s1168_s30  ;;  %s1169_s4 = smov 2  }
  0x19   :  { %58 = sst [smem:[#allocation12 + $0x2]] %s1169_s4  ;;  %s1170_s5 = smov 128  }
  0x1a   :  { %60 = sst [smem:[#allocation12 + $0x3]] %s1170_s5  ;;  %s1171_s7 = smov 8  }
  0x1b   :  { %s1058_s0 = sshll.u32 %s39_s26, 26  ;;  %62 = sst [smem:[#allocation12 + $0x4]] %s1170_s5 }
  0x1c   :  { %s1059_s6 = sadd.s32 134217728, %s1058_s0  ;;  %64 = sst [smem:[#allocation12 + $0x5]] %s1171_s7 }
  0x1d   :  { %s1172_s8 = smov [#allocation4]   ;;  %s1173_s9 = smov [#allocation11]  }
  0x1e   :  { %66 = dma.general %s2210_s2, 512, %s48_s28, %s1172_s8, %s1173_s9, [#allocation12], %s1059_s6, 0  }
  0x1f   :  { %1156 = dma.done.wait [#allocation6], 16  }
  0x20   :  { %1157 = vsyncadd [#allocation6], 4294967280 }
  0x21   :  { %1158 = dma.done.wait [#allocation7], 16  }
  0x22   :  { %1159 = vsyncadd [#allocation7], 4294967280 }
  0x23   :  { %1160 = dma.done.wait [#allocation4], 512  }
  0x24   :  { %1161 = vsyncadd [#allocation4], 4294966784 }
  0x25   :  { %76 = sfence }
  0x26   :  { %v1219_v0 = vld [vmem:[#allocation9 + $0x10] sm:$0xff]  ;;  %v1221_v1 = vld [vmem:[#allocation9] sm:$0xff]  ;;  %vm77_vm0 = vcmask 146432   ;;  %s1174_s12 = smov 1   ;;  %vm80_vm1 = vcmask 140288   ;;  %v1227_v2 = vld [vmem:[#allocation9 + $0x18] sm:$0xff] }
  0x27   :  { %2230 = vst [vmem:[#allocation17_spill] sm:$0xff] %v1219_v0  ;;  %97 = vrot.lane.b32.xlu1 %v1219_v0, %s1174_s12  ;;  %93 = vrot.lane.b32.xlu0 %v1221_v1, %s1174_s12  ;;  %2231 = vst [vmem:[#allocation18_spill] sm:$0xff] %v1227_v2  ;;  %v1229_v3 = vld [vmem:[#allocation9 + $0x8] sm:$0xff]  ;;  %v1175_v4 = vmov 0.0   ;;  %vm105_vm2 = vcmask 138248   ;;  %s1176_s2 = smov 127  }
  0x28   :  { %2232 = vst [vmem:[#allocation19_spill] sm:$0xff] %v1229_v3  ;;  %82 = vst.msk [vmem:[#allocation2 + $0x18] sm:$0xff] %vm77_vm0, %v1175_v4  ;;  %s1177_s13 = smov 126   ;;  %s1062_s14 = sld [smem:[#allocation3 + $0x3]] }
  0x29   :  { %83 = vst.msk [vmem:[#allocation2 + $0x20] sm:$0xff] %vm77_vm0, %v1175_v4  ;;  %78 = vst.msk [vmem:[#allocation2] sm:$0xff] %vm77_vm0, %v1175_v4  ;;  %s1068_s15 = sld [smem:[#allocation3 + $0x9]]  ;;  %s1075_s16 = sld [smem:[#allocation3 + $0xf]] }
  0x2a   :  { %79 = vst.msk [vmem:[#allocation2 + $0x8] sm:$0xff] %vm77_vm0, %v1175_v4  ;;  %s790_s17 = sld [smem:[#allocation3]]  ;;  %s1685_s18 = sld [smem:[#allocation3 + $0x6]]  ;;  %vm868_vm0 = vcmask 130048  }
  0x2b   :  { %84 = vst.msk [vmem:[#allocation2 + $0x28] sm:$0x3] %vm80_vm1, %v1175_v4  ;;  %81 = vst.msk [vmem:[#allocation2 + $0x10] sm:$0x3] %vm80_vm1, %v1175_v4  ;;  %99 = vrot.lane.b32.xlu1 %v1227_v2, %s1174_s12  ;;  %95 = vrot.lane.b32.xlu0 %v1229_v3, %s1174_s12  ;;  %s1687_s19 = sld [smem:[#allocation3 + $0xc]]  ;;  %s1693_s20 = sld [smem:[#allocation3 + $0x1]] }
  0x2c   :  { %s1695_s21 = sld [smem:[#allocation3 + $0x7]]  ;;  %s1713_s22 = sld [smem:[#allocation3 + $0xd]] }
  0x2d   :  { %s1757_s23 = sld [smem:[#allocation3 + $0x2]]  ;;  %s1766_s24 = sld [smem:[#allocation3 + $0x8]] }
  0x2e   :  { %s1780_s1 = sld [smem:[#allocation3 + $0xe]]  ;;  %s1786_s25 = sld [smem:[#allocation3 + $0x5]] }
  0x2f   :  { %s1788_s26 = sld [smem:[#allocation3 + $0xb]]  ;;  %s1797_s27 = sld [smem:[#allocation3 + $0x4]] }
  0x30   :  { %s1799_s28 = sld [smem:[#allocation3 + $0xa]]  ;;  %s1819_s29 = sld [smem:[#allocation8]] }
  0x31   :  { %s2113_s30 = sld [smem:[#allocation8 + $0x1]]  ;;  %s2115_s4 = sld [smem:[#allocation3 + $0x10]] }
  0x32   :  { %s2125_s0 = sld [smem:[#allocation3 + $0x11]]  ;;  %s1078_s5 = sld [smem:[#allocation8 + $0x2]] }
  0x33   :  { %s1178_s6 = smov [#allocation10]  }
  0x34   :  { %s1044_s7 = sshll.u32 %s1178_s6, 4  ;;  %s1045_s7 = int_to_ptr.vmem [resolvable:$true] %s1044_s7 }
  0x35   :  { %s1134_s8 = scalar_lea.vmem %s1045_s7, 1536  ;;  %p1139_p9 = scmp.lt.s32.totalorder %s1045_s7, %s1045_s7 }
  0x36   :  { %p1135_p8 = scmp.ne.s32.totalorder %s1045_s7, %s1134_s8  ;;  %p1140_p10 = scmp.lt.s32.totalorder %s1134_s8, %s1134_s8 }
  0x38   :  { %p1141_p11 = por %p1140_p10, %p1139_p9 }
  0x3a   :  { %p1142_p12 = pnand %p1141_p11, %p1135_p8 }
  0x99   :  { %v98_v5 = vpop.permute.xlu1 %97  ;;  %v94_v6 = vpop.permute.xlu0 %93 }
  0x9a   :  { %108 = vst.msk [vmem:[#allocation2 + $0x19] sm:$0xff] %vm105_vm2, %v98_v5  ;;  %106 = vst.msk [vmem:[#allocation2 + $0x1] sm:$0xff] %vm105_vm2, %v94_v6 }
  0x9d   :  { %v100_v7 = vpop.permute.xlu1 %99  ;;  %v96_v8 = vpop.permute.xlu0 %95 }
  0x9e   :  { %109 = vst.msk [vmem:[#allocation2 + $0x21] sm:$0xff] %vm105_vm2, %v100_v7  ;;  %107 = vst.msk [vmem:[#allocation2 + $0x9] sm:$0xff] %vm105_vm2, %v96_v8 }
  0xa1   :  { %v1235_v9 = vld [vmem:[#allocation2] sm:$0xff]  ;;  %v1239_v10 = vld [vmem:[#allocation2 + $0x18] sm:$0xff] }
  0xa2   :  { %146 = vrot.lane.b32.xlu0 %v1235_v9, %s1176_s2  ;;  %v1257_v13 = vld [vmem:[#allocation2 + $0x1] sm:$0xff]  ;;  %v1265_v15 = vld [vmem:[#allocation2 + $0x19] sm:$0xff]  ;;  %v1305_v20 = vmul.f32 %v1235_v9, %v1235_v9  ;;  %v1319_v23 = vmul.f32 %v1239_v10, %v1239_v10  ;;  %v182_v25 = vmul.f32 0.12384141, %v1235_v9  ;;  %v184_v27 = vmul.f32 0.12384141, %v1239_v10 }
  0xa3   :  { %v206_v29 = vmul.f32 -2.0, %v1235_v9  ;;  %v208_v31 = vmul.f32 -2.0, %v1239_v10  ;;  %v1354_v33 = vmul.f32 0.07511361, %v1235_v9  ;;  %v1364_v35 = vmul.f32 0.07511361, %v1239_v10 }
  0xa4   :  { %v1374_v37 = vmul.f32 -1.0, %v1235_v9  ;;  %v1384_v39 = vmul.f32 -1.0, %v1239_v10  ;;  %v1395_v41 = vmul.f32 %v1257_v13, %v1257_v13  ;;  %v1407_v43 = vmul.f32 %v1265_v15, %v1265_v15 }
  0xa5   :  { %v1241_v11 = vld [vmem:[#allocation2 + $0x8] sm:$0xff]  ;;  %v1247_v12 = vld [vmem:[#allocation2 + $0x20] sm:$0xff]  ;;  %v394_v45 = vmul.f32 0.20417996, %v1257_v13  ;;  %v396_v47 = vmul.f32 0.20417996, %v1265_v15 }
  0xa6   :  { %148 = vrot.lane.b32.xlu1 %v1241_v11, %s1176_s2  ;;  %150 = vrot.lane.b32.xlu0 %v1239_v10, %s1176_s2  ;;  %v1263_v14 = vld [vmem:[#allocation2 + $0x9] sm:$0xff]  ;;  %v1271_v16 = vld [vmem:[#allocation2 + $0x21] sm:$0xff]  ;;  %v1315_v22 = vmul.f32 %v1241_v11, %v1241_v11  ;;  %v1327_v24 = vmul.f32 %v1247_v12, %v1247_v12  ;;  %v183_v26 = vmul.f32 0.12384141, %v1241_v11  ;;  %v185_v28 = vmul.f32 0.12384141, %v1247_v12 }
  0xa7   :  { %v1289_v17 = vld [vmem:[#allocation2 + $0x2] sm:$0xff]  ;;  %v1295_v18 = vld [vmem:[#allocation2 + $0xa] sm:$0xff]  ;;  %v1297_v19 = vld [vmem:[#allocation2 + $0x1a] sm:$0xff]  ;;  %v207_v30 = vmul.f32 -2.0, %v1241_v11  ;;  %v209_v32 = vmul.f32 -2.0, %v1247_v12  ;;  %v1381_v38 = vmul.f32 -1.0, %v1241_v11  ;;  %v1403_v42 = vmul.f32 %v1263_v14, %v1263_v14 }
  0xa8   :  { %v1307_v21 = vld [vmem:[#allocation2 + $0x22] sm:$0xff]  ;;  %v1361_v34 = vmul.f32 0.07511361, %v1241_v11  ;;  %v1371_v36 = vmul.f32 0.07511361, %v1247_v12  ;;  %v1391_v40 = vmul.f32 -1.0, %v1247_v12  ;;  %v1415_v44 = vmul.f32 %v1271_v16, %v1271_v16 }
  0xa9   :  { %v395_v46 = vmul.f32 0.20417996, %v1263_v14  ;;  %v397_v48 = vmul.f32 0.20417996, %v1271_v16  ;;  %v1435_v52 = vmul.f32 %v1289_v17, %v1289_v17  ;;  %v1445_v55 = vmul.f32 %v1295_v18, %v1295_v18 }
  0xaa   :  { %152 = vrot.lane.b32.xlu1 %v1247_v12, %s1176_s2  ;;  %230 = vrot.lane.b32.xlu0 %v1235_v9, %s1177_s13  ;;  %v1449_v56 = vmul.f32 %v1297_v19, %v1297_v19  ;;  %v1461_v59 = vmul.f32 %v1307_v21, %v1307_v21 }
  0xab   :  { %2233 = vst [vmem:[#allocation20_spill] sm:$0xff] %v1445_v55 }
  0xac   :  { %2234 = vst [vmem:[#allocation21_spill] sm:$0xff] %v1449_v56  ;;  %2235 = vst [vmem:[#allocation22_spill] sm:$0xff] %v1461_v59 }
  0xae   :  { %232 = vrot.lane.b32.xlu1 %v1241_v11, %s1177_s13  ;;  %234 = vrot.lane.b32.xlu0 %v1239_v10, %s1177_s13 }
  0xb2   :  { %236 = vrot.lane.b32.xlu1 %v1247_v12, %s1177_s13  ;;  %334 = vrot.lane.b32.xlu0 %v1257_v13, %s1174_s12 }
  0xb6   :  { %336 = vrot.lane.b32.xlu1 %v1263_v14, %s1174_s12  ;;  %338 = vrot.lane.b32.xlu0 %v1265_v15, %s1174_s12 }
  0xba   :  { %340 = vrot.lane.b32.xlu1 %v1271_v16, %s1174_s12  ;;  %358 = vrot.lane.b32.xlu0 %v1257_v13, %s1176_s2 }
  0xbe   :  { %360 = vrot.lane.b32.xlu1 %v1263_v14, %s1176_s2  ;;  %362 = vrot.lane.b32.xlu0 %v1265_v15, %s1176_s2 }
  0xc2   :  { %364 = vrot.lane.b32.xlu1 %v1271_v16, %s1176_s2  ;;  %426 = vrot.lane.b32.xlu0 %v1257_v13, %s1177_s13 }
  0xc6   :  { %428 = vrot.lane.b32.xlu1 %v1263_v14, %s1177_s13  ;;  %430 = vrot.lane.b32.xlu0 %v1265_v15, %s1177_s13 }
  0xca   :  { %432 = vrot.lane.b32.xlu1 %v1271_v16, %s1177_s13  ;;  %546 = vrot.lane.b32.xlu0 %v1289_v17, %s1176_s2 }
  0xce   :  { %548 = vrot.lane.b32.xlu1 %v1295_v18, %s1176_s2  ;;  %550 = vrot.lane.b32.xlu0 %v1297_v19, %s1176_s2 }
  0xd2   :  { %552 = vrot.lane.b32.xlu1 %v1307_v21, %s1176_s2  ;;  %166 = vrot.lane.b32.xlu0 %v1305_v20, %s1176_s2 }
  0xd6   :  { %168 = vrot.lane.b32.xlu1 %v1315_v22, %s1176_s2  ;;  %170 = vrot.lane.b32.xlu0 %v1319_v23, %s1176_s2 }
  0xda   :  { %172 = vrot.lane.b32.xlu1 %v1327_v24, %s1176_s2  ;;  %190 = vrot.lane.b32.xlu0 %v182_v25, %s1176_s2 }
  0xde   :  { %192 = vrot.lane.b32.xlu1 %v183_v26, %s1176_s2  ;;  %194 = vrot.lane.b32.xlu0 %v184_v27, %s1176_s2 }
  0xe2   :  { %196 = vrot.lane.b32.xlu1 %v185_v28, %s1176_s2  ;;  %214 = vrot.lane.b32.xlu0 %v206_v29, %s1176_s2 }
  0xe6   :  { %216 = vrot.lane.b32.xlu1 %v207_v30, %s1176_s2  ;;  %218 = vrot.lane.b32.xlu0 %v208_v31, %s1176_s2 }
  0xea   :  { %220 = vrot.lane.b32.xlu1 %v209_v32, %s1176_s2  ;;  %246 = vrot.lane.b32.xlu0 %v1305_v20, %s1177_s13  ;;  %v482_v32 = vmul.f32 2.0, %v1257_v13 }
  0xee   :  { %248 = vrot.lane.b32.xlu1 %v1315_v22, %s1177_s13  ;;  %250 = vrot.lane.b32.xlu0 %v1319_v23, %s1177_s13 }
  0xf2   :  { %252 = vrot.lane.b32.xlu1 %v1327_v24, %s1177_s13  ;;  %266 = vrot.lane.b32.xlu0 %v1354_v33, %s1177_s13 }
  0xf6   :  { %268 = vrot.lane.b32.xlu1 %v1361_v34, %s1177_s13  ;;  %270 = vrot.lane.b32.xlu0 %v1364_v35, %s1177_s13 }
  0xfa   :  { %272 = vrot.lane.b32.xlu1 %v1371_v36, %s1177_s13  ;;  %290 = vrot.lane.b32.xlu0 %v1374_v37, %s1177_s13 }
  0xfe   :  { %292 = vrot.lane.b32.xlu1 %v1381_v38, %s1177_s13  ;;  %294 = vrot.lane.b32.xlu0 %v1384_v39, %s1177_s13 }
 0x102   :  { %296 = vrot.lane.b32.xlu1 %v1391_v40, %s1177_s13  ;;  %378 = vrot.lane.b32.xlu0 %v1395_v41, %s1176_s2 }
 0x106   :  { %380 = vrot.lane.b32.xlu1 %v1403_v42, %s1176_s2  ;;  %382 = vrot.lane.b32.xlu0 %v1407_v43, %s1176_s2 }
 0x10a   :  { %384 = vrot.lane.b32.xlu1 %v1415_v44, %s1176_s2  ;;  %402 = vrot.lane.b32.xlu0 %v394_v45, %s1176_s2 }
 0x10e   :  { %404 = vrot.lane.b32.xlu1 %v395_v46, %s1176_s2  ;;  %406 = vrot.lane.b32.xlu0 %v396_v47, %s1176_s2 }
 0x112   :  { %408 = vrot.lane.b32.xlu1 %v397_v48, %s1176_s2  ;;  %442 = vrot.lane.b32.xlu0 %v1395_v41, %s1177_s13 }
 0x114   :  { %v147_v49 = vpop.permute.xlu0 %146 }
 0x115   :  { %v158_v5 = vadd.f32 %v147_v49, %v1235_v9 }
 0x116   :  { %444 = vrot.lane.b32.xlu1 %v1403_v42, %s1177_s13  ;;  %446 = vrot.lane.b32.xlu0 %v1407_v43, %s1177_s13 }
 0x118   :  { %v149_v50 = vpop.permute.xlu1 %148  ;;  %v151_v51 = vpop.permute.xlu0 %150 }
 0x119   :  { %v160_v4 = vadd.f32 %v151_v51, %v1239_v10  ;;  %v159_v27 = vadd.f32 %v149_v50, %v1241_v11 }
 0x11a   :  { %448 = vrot.lane.b32.xlu1 %v1415_v44, %s1177_s13  ;;  %566 = vrot.lane.b32.xlu0 %v1435_v52, %s1176_s2 }
 0x11c   :  { %v153_v53 = vpop.permute.xlu1 %152  ;;  %v1441_v54 = vpop.permute.xlu0 %230 }
 0x11d   :  { %v161_v25 = vadd.f32 %v153_v53, %v1247_v12  ;;  %v242_v26 = vadd.f32 %v1441_v54, %v158_v5  ;;  %v483_v53 = vmul.f32 2.0, %v1263_v14 }
 0x11e   :  { %568 = vrot.lane.b32.xlu1 %v1445_v55, %s1176_s2  ;;  %570 = vrot.lane.b32.xlu0 %v1449_v56, %s1176_s2 }
 0x11f   :  { %v310_v46 = vadd.f32 %v1257_v13, %v242_v26 }
 0x120   :  { %v1455_v57 = vpop.permute.xlu1 %232  ;;  %v1457_v58 = vpop.permute.xlu0 %234 }
 0x121   :  { %v244_v6 = vadd.f32 %v1457_v58, %v160_v4  ;;  %v243_v45 = vadd.f32 %v1455_v57, %v159_v27  ;;  %v484_v4 = vmul.f32 2.0, %v1265_v15 }
 0x122   :  { %572 = vrot.lane.b32.xlu1 %v1461_v59, %s1176_s2  ;;  %634 = vrot.lane.b32.xlu0 %v1289_v17, %s1177_s13 }
 0x123   :  { %v312_v29 = vadd.f32 %v1265_v15, %v244_v6  ;;  %v311_v5 = vadd.f32 %v1263_v14, %v243_v45 }
 0x124   :  { %v1467_v60 = vpop.permute.xlu1 %236  ;;  %v1469_v61 = vpop.permute.xlu0 %334 }
 0x125   :  { %v245_v28 = vadd.f32 %v1467_v60, %v161_v25 }
 0x126   :  { %636 = vrot.lane.b32.xlu1 %v1295_v18, %s1177_s13  ;;  %638 = vrot.lane.b32.xlu0 %v1297_v19, %s1177_s13 }
 0x127   :  { %v313_v49 = vadd.f32 %v1271_v16, %v245_v28 }
 0x128   :  { %v1475_v62 = vpop.permute.xlu1 %336  ;;  %v1477_v63 = vpop.permute.xlu0 %338 }
 0x12a   :  { %640 = vrot.lane.b32.xlu1 %v1307_v21, %s1177_s13  ;;  %650 = vrot.lane.b32.xlu0 %v1435_v52, %s1177_s13 }
 0x12c   :  { %v1486_v7 = vpop.permute.xlu1 %340  ;;  %v1488_v8 = vpop.permute.xlu0 %358 }
 0x12d   :  { %v370_v48 = vadd.f32 %v1488_v8, %v310_v46 }
 0x12e   :  { %652 = vrot.lane.b32.xlu1 %v1445_v55, %s1177_s13  ;;  %654 = vrot.lane.b32.xlu0 %v1449_v56, %s1177_s13  ;;  %v420_v56 = vmul.f32 -4.0, %v1265_v15 }
 0x130   :  { %v1499_v30 = vpop.permute.xlu1 %360  ;;  %v1501_v31 = vpop.permute.xlu0 %362 }
 0x131   :  { %v372_v47 = vadd.f32 %v1501_v31, %v312_v29  ;;  %v371_v26 = vadd.f32 %v1499_v30, %v311_v5  ;;  %v485_v29 = vmul.f32 2.0, %v1271_v16 }
 0x132   :  { %656 = vrot.lane.b32.xlu1 %v1461_v59, %s1177_s13  ;;  %490 = vrot.lane.b32.xlu0 %v482_v32, %s1177_s13  ;;  %v610_v32 = vmul.f32 2.0, %v1289_v17 }
 0x134   :  { %v1512_v50 = vpop.permute.xlu1 %364  ;;  %v427_v51 = vpop.permute.xlu0 %426 }
 0x135   :  { %v373_v6 = vadd.f32 %v1512_v50, %v313_v49  ;;  %v438_v25 = vadd.f32 %v427_v51, %v370_v48  ;;  %v611_v51 = vmul.f32 2.0, %v1295_v18 }
 0x136   :  { %492 = vrot.lane.b32.xlu1 %v483_v53, %s1177_s13  ;;  %494 = vrot.lane.b32.xlu0 %v484_v4, %s1177_s13  ;;  %v612_v53 = vmul.f32 2.0, %v1297_v19 }
 0x137   :  { %v510_v45 = vadd.f32 %v1289_v17, %v438_v25  ;;  %v613_v25 = vmul.f32 2.0, %v1307_v21 }
 0x138   :  { %v429_v27 = vpop.permute.xlu1 %428  ;;  %v431_v28 = vpop.permute.xlu0 %430 }
 0x139   :  { %v439_v46 = vadd.f32 %v429_v27, %v371_v26  ;;  %v440_v59 = vadd.f32 %v431_v28, %v372_v47 }
 0x13a   :  { %496 = vrot.lane.b32.xlu1 %v485_v29, %s1177_s13  ;;  %618 = vrot.lane.b32.xlu0 %v610_v32, %s1176_s2  ;;  %v1536_v29 = vmul.f32 0.12384141, %v1257_v13 }
 0x13b   :  { %v511_v47 = vadd.f32 %v1295_v18, %v439_v46  ;;  %v512_v26 = vadd.f32 %v1297_v19, %v440_v59 }
 0x13c   :  { %v433_v48 = vpop.permute.xlu1 %432  ;;  %v547_v49 = vpop.permute.xlu0 %546 }
 0x13d   :  { %v441_v4 = vadd.f32 %v433_v48, %v373_v6  ;;  %v1528_v5 = vadd.f32 %v547_v49, %v510_v45  ;;  %v1547_v48 = vmul.f32 0.12384141, %v1263_v14  ;;  %v1550_v49 = vmul.f32 0.12384141, %v1265_v15 }
 0x13e   :  { %620 = vrot.lane.b32.xlu1 %v611_v51, %s1176_s2  ;;  %622 = vrot.lane.b32.xlu0 %v612_v53, %s1176_s2 }
 0x13f   :  { %v513_v46 = vadd.f32 %v1307_v21, %v441_v4  ;;  %v1563_v4 = vmul.f32 0.12384141, %v1271_v16 }
 0x140   :  { %v549_v27 = vpop.permute.xlu1 %548  ;;  %v551_v28 = vpop.permute.xlu0 %550 }
 0x141   :  { %v1538_v32 = vadd.f32 %v549_v27, %v511_v47  ;;  %v1540_v6 = vadd.f32 %v551_v28, %v512_v26  ;;  %v582_v26 = vmul.f32 0.12384141, %v1289_v17  ;;  %v346_v27 = vadd.f32 %v1469_v61, %v1235_v9 }
 0x142   :  { %624 = vrot.lane.b32.xlu1 %v613_v25, %s1176_s2  ;;  %462 = vrot.lane.b32.xlu0 %v1536_v29, %s1177_s13  ;;  %v418_v28 = vmul.f32 -4.0, %v1257_v13  ;;  %v347_v9 = vadd.f32 %v1475_v62, %v1241_v11  ;;  %v348_v61 = vadd.f32 %v1477_v63, %v1239_v10  ;;  %v1593_v11 = vmul.f32 0.07511361, %v1289_v17 }
 0x143   :  { %2236 = vst [vmem:[#allocation23_spill] sm:$0xff] %v1540_v6  ;;  %v349_v63 = vadd.f32 %v1486_v7, %v1247_v12  ;;  %v1608_v12 = vmul.f32 0.07511361, %v1297_v19  ;;  %v817_v7 = vstv %s1062_s14 }
 0x144   :  { %v553_v45 = vpop.permute.xlu1 %552  ;;  %v167_v59 = vpop.permute.xlu0 %166  ;;  %v422_v2 = vadd.f32 %v418_v28, %v346_v27  ;;  %v585_v27 = vmul.f32 0.12384141, %v1307_v21  ;;  %2238 = vst [vmem:[#allocation25_spill] sm:$0xff] %v1593_v11  ;;  %v424_v62 = vadd.f32 %v420_v56, %v348_v61 }
 0x145   :  { %v1552_v51 = vadd.f32 %v553_v45, %v513_v46  ;;  %v583_v45 = vmul.f32 0.12384141, %v1295_v18  ;;  %2240 = vst [vmem:[#allocation27_spill] sm:$0xff] %v1608_v12 }
 0x146   :  { %464 = vrot.lane.b32.xlu1 %v1547_v48, %s1177_s13  ;;  %466 = vrot.lane.b32.xlu0 %v1550_v49, %s1177_s13  ;;  %v478_v55 = vadd.f32 %v422_v2, %v1488_v8  ;;  %v421_v2 = vmul.f32 -4.0, %v1271_v16  ;;  %v1602_v8 = vmul.f32 0.07511361, %v1295_v18 }
 0x147   :  { %2237 = vst [vmem:[#allocation24_spill] sm:$0xff] %v1552_v51  ;;  %v584_v51 = vmul.f32 0.12384141, %v1297_v19 }
 0x148   :  { %v1558_v53 = vpop.permute.xlu1 %168  ;;  %v1560_v47 = vpop.permute.xlu0 %170  ;;  %2239 = vst [vmem:[#allocation26_spill] sm:$0xff] %v1602_v8  ;;  %v425_v61 = vadd.f32 %v421_v2, %v349_v63  ;;  %v178_v63 = vadd.f32 %v167_v59, %v1305_v20 }
 0x149   :  { %v180_v20 = vadd.f32 %v1560_v47, %v1319_v23 }
 0x14a   :  { %468 = vrot.lane.b32.xlu1 %v1563_v4, %s1177_s13  ;;  %590 = vrot.lane.b32.xlu0 %v582_v26, %s1176_s2  ;;  %v419_v26 = vmul.f32 -4.0, %v1263_v14 }
 0x14c   :  { %v1572_v25 = vpop.permute.xlu1 %172  ;;  %v1574_v46 = vpop.permute.xlu0 %190  ;;  %v423_v10 = vadd.f32 %v419_v26, %v347_v9  ;;  %v481_v26 = vadd.f32 %v425_v61, %v1512_v50  ;;  %v179_v50 = vadd.f32 %v1558_v53, %v1315_v22 }
 0x14d   :  { %v202_v22 = vadd.f32 %v1574_v46, %v1354_v33 }
 0x14e   :  { %592 = vrot.lane.b32.xlu1 %v583_v45, %s1176_s2  ;;  %594 = vrot.lane.b32.xlu0 %v584_v51, %s1176_s2  ;;  %v606_v51 = vadd.f32 %v1289_v17, %v478_v55  ;;  %v479_v28 = vadd.f32 %v423_v10, %v1499_v30  ;;  %v480_v45 = vadd.f32 %v424_v62, %v1501_v31  ;;  %v1615_v55 = vmul.f32 0.07511361, %v1307_v21 }
 0x14f   :  { %v609_v2 = vadd.f32 %v1307_v21, %v481_v26 }
 0x150   :  { %v1587_v0 = vpop.permute.xlu1 %192  ;;  %v1589_v6 = vpop.permute.xlu0 %194  ;;  %2241 = vst [vmem:[#allocation28_spill] sm:$0xff] %v1615_v55  ;;  %v607_v30 = vadd.f32 %v1295_v18, %v479_v28  ;;  %v608_v31 = vadd.f32 %v1297_v19, %v480_v45  ;;  %v818_v62 = vmul.f32 %v817_v7, %v606_v51  ;;  %v900_v45 = vstv %s1068_s15 }
 0x151   :  { %v821_v26 = vmul.f32 %v817_v7, %v609_v2 }
 0x152   :  { %596 = vrot.lane.b32.xlu1 %v585_v27, %s1176_s2  ;;  %670 = vrot.lane.b32.xlu0 %v1593_v11, %s1177_s13  ;;  %v819_v11 = vmul.f32 %v817_v7, %v607_v30  ;;  %v820_v28 = vmul.f32 %v817_v7, %v608_v31  ;;  %v902_v47 = vmul.f32 %v900_v45, %v607_v30 }
 0x154   :  { %v197_v56 = vpop.permute.xlu1 %196  ;;  %v215_v9 = vpop.permute.xlu0 %214 }
 0x156   :  { %672 = vrot.lane.b32.xlu1 %v1602_v8, %s1177_s13  ;;  %674 = vrot.lane.b32.xlu0 %v1608_v12, %s1177_s13 }
 0x158   :  { %v217_v27 = vpop.permute.xlu1 %216  ;;  %v219_v10 = vpop.permute.xlu0 %218 }
 0x15a   :  { %676 = vrot.lane.b32.xlu1 %v1615_v55, %s1177_s13  ;;  %826 = vrot.lane.b32.xlu0 %v818_v62, %s1176_s2  ;;  %v901_v62 = vmul.f32 %v900_v45, %v606_v51 }
 0x15c   :  { %v221_v12 = vpop.permute.xlu1 %220  ;;  %v247_v8 = vpop.permute.xlu0 %246 }
 0x15d   :  { %v1625_v3 = vadd.f32 %v247_v8, %v178_v63  ;;  %v903_v63 = vmul.f32 %v900_v45, %v608_v31 }
 0x15e   :  { %828 = vrot.lane.b32.xlu1 %v819_v11, %s1176_s2  ;;  %830 = vrot.lane.b32.xlu0 %v820_v28, %s1176_s2  ;;  %v181_v11 = vadd.f32 %v1572_v25, %v1327_v24  ;;  %v204_v24 = vadd.f32 %v1589_v6, %v1364_v35 }
 0x160   :  { %v249_v59 = vpop.permute.xlu1 %248  ;;  %v251_v61 = vpop.permute.xlu0 %250 }
 0x161   :  { %v1633_v55 = vadd.f32 %v249_v59, %v179_v50  ;;  %v1635_v8 = vadd.f32 %v251_v61, %v180_v20  ;;  %v983_v50 = vstv %s1075_s16  ;;  %v203_v20 = vadd.f32 %v1587_v0, %v1361_v34 }
 0x162   :  { %832 = vrot.lane.b32.xlu1 %v821_v26, %s1176_s2  ;;  %909 = vrot.lane.b32.xlu0 %v901_v62, %s1176_s2  ;;  %v904_v59 = vmul.f32 %v900_v45, %v609_v2  ;;  %v984_v61 = vmul.f32 %v983_v50, %v606_v51  ;;  %v985_v6 = vmul.f32 %v983_v50, %v607_v30 }
 0x164   :  { %v253_v53 = vpop.permute.xlu1 %252  ;;  %v267_v23 = vpop.permute.xlu0 %266 }
 0x165   :  { %v1643_v7 = vadd.f32 %v253_v53, %v181_v11  ;;  %v278_v28 = vadd.f32 %v267_v23, %v202_v22  ;;  %v205_v11 = vadd.f32 %v197_v56, %v1371_v36  ;;  %v226_v22 = vadd.f32 %v215_v9, %v1374_v37 }
 0x166   :  { %911 = vrot.lane.b32.xlu1 %v902_v47, %s1176_s2  ;;  %913 = vrot.lane.b32.xlu0 %v903_v63, %s1176_s2  ;;  %v986_v53 = vmul.f32 %v983_v50, %v608_v31  ;;  %v227_v23 = vadd.f32 %v217_v27, %v1381_v38  ;;  %v228_v36 = vadd.f32 %v219_v10, %v1384_v39 }
 0x167   :  { %v326_v33 = vadd.f32 %v1536_v29, %v278_v28  ;;  %v229_v31 = vadd.f32 %v221_v12, %v1391_v40 }
 0x168   :  { %v269_v25 = vpop.permute.xlu1 %268  ;;  %v271_v46 = vpop.permute.xlu0 %270 }
 0x169   :  { %v279_v26 = vadd.f32 %v269_v25, %v203_v20  ;;  %v280_v62 = vadd.f32 %v271_v46, %v204_v24 }
 0x16a   :  { %915 = vrot.lane.b32.xlu1 %v904_v59, %s1176_s2  ;;  %992 = vrot.lane.b32.xlu0 %v984_v61, %s1176_s2 }
 0x16b   :  { %v327_v0 = vadd.f32 %v1547_v48, %v279_v26  ;;  %v328_v34 = vadd.f32 %v1550_v49, %v280_v62  ;;  %v987_v49 = vmul.f32 %v983_v50, %v609_v2 }
 0x16c   :  { %v273_v35 = vpop.permute.xlu1 %272  ;;  %v291_v29 = vpop.permute.xlu0 %290 }
 0x16d   :  { %v281_v45 = vadd.f32 %v273_v35, %v205_v11  ;;  %v1658_v51 = vadd.f32 %v291_v29, %v226_v22  ;;  %v283_v29 = vadd.f32 %v1455_v57, %v1381_v38  ;;  %v1719_v38 = vmul.f32 -1.0, %v1297_v19 }
 0x16e   :  { %994 = vrot.lane.b32.xlu1 %v985_v6, %s1176_s2  ;;  %996 = vrot.lane.b32.xlu0 %v986_v53, %s1176_s2  ;;  %v318_v6 = vadd.f32 %v1395_v41, %v1625_v3  ;;  %v350_v53 = vmul.f32 -2.0, %v1257_v13  ;;  %v352_v13 = vmul.f32 -2.0, %v1265_v15  ;;  %v1729_v57 = vmul.f32 -1.0, %v1307_v21 }
 0x16f   :  { %v329_v56 = vadd.f32 %v1563_v4, %v281_v45  ;;  %v284_v45 = vadd.f32 %v1457_v58, %v1384_v39  ;;  %v319_v39 = vadd.f32 %v1403_v42, %v1633_v55  ;;  %v320_v58 = vadd.f32 %v1407_v43, %v1635_v8 }
 0x170   :  { %v293_v48 = vpop.permute.xlu1 %292  ;;  %v295_v9 = vpop.permute.xlu0 %294  ;;  %v321_v8 = vadd.f32 %v1415_v44, %v1643_v7 }
 0x171   :  { %v1665_v47 = vadd.f32 %v293_v48, %v227_v23  ;;  %v1667_v30 = vadd.f32 %v295_v9, %v228_v36  ;;  %v1707_v23 = vmul.f32 -1.0, %v1289_v17  ;;  %v351_v36 = vmul.f32 -2.0, %v1263_v14 }
 0x172   :  { %998 = vrot.lane.b32.xlu1 %v987_v49, %s1176_s2  ;;  %v1737_v55 = vadd.f32 %v352_v13, %v284_v45  ;;  %v874_v9 = vstv %s1685_s18  ;;  %v957_v49 = vstv %s1687_s19  ;;  %v2245_v45 = vld [vmem:[#allocation20_spill] sm:$0xff] }
 0x173   :  { %v1735_v48 = vadd.f32 %v351_v36, %v283_v29  ;;  %v1769_v44 = vmul.f32 %v957_v49, %v1221_v1  ;;  %v1778_v29 = vstv %s1713_s22 }
 0x174   :  { %v297_v63 = vpop.permute.xlu1 %296  ;;  %v379_v28 = vpop.permute.xlu0 %378 }
 0x175   :  { %v1671_v20 = vadd.f32 %v297_v63, %v229_v31  ;;  %v390_v3 = vadd.f32 %v379_v28, %v318_v6  ;;  %v2243_v6 = vld [vmem:[#allocation23_spill] sm:$0xff] }
 0x178   :  { %v381_v27 = vpop.permute.xlu1 %380  ;;  %v383_v24 = vpop.permute.xlu0 %382 }
 0x179   :  { %v391_v42 = vadd.f32 %v381_v27, %v319_v39  ;;  %v2246_v39 = vld [vmem:[#allocation21_spill] sm:$0xff] }
 0x17c   :  { %v1673_v10 = vpop.permute.xlu1 %384  ;;  %v403_v4 = vpop.permute.xlu0 %402 }
 0x17d   :  { %v1675_v25 = vadd.f32 %v403_v4, %v326_v33  ;;  %v393_v7 = vadd.f32 %v1673_v10, %v321_v8  ;;  %v2248_v8 = vld [vmem:[#allocation24_spill] sm:$0xff] }
 0x180   :  { %v405_v2 = vpop.permute.xlu1 %404  ;;  %v407_v50 = vpop.permute.xlu0 %406 }
 0x181   :  { %v1677_v46 = vadd.f32 %v405_v2, %v327_v0  ;;  %v1679_v59 = vadd.f32 %v407_v50, %v328_v34  ;;  %v282_v34 = vadd.f32 %v1441_v54, %v1374_v37  ;;  %v285_v37 = vadd.f32 %v1467_v60, %v1391_v40 }
 0x182   :  { %v353_v54 = vmul.f32 -2.0, %v1271_v16  ;;  %v791_v40 = vstv %s790_s17  ;;  %v392_v16 = vadd.f32 %v383_v24, %v320_v58  ;;  %v1755_v2 = vstv %s1693_s20 }
 0x183   :  { %v1733_v60 = vadd.f32 %v350_v53, %v282_v34  ;;  %v1746_v43 = vmul.f32 %v791_v40, %v1221_v1  ;;  %v1760_v24 = vstv %s1695_s21 }
 0x184   :  { %v409_v61 = vpop.permute.xlu1 %408  ;;  %v443_v26 = vpop.permute.xlu0 %442  ;;  %v1743_v63 = vadd.f32 %v353_v54, %v285_v37 }
 0x185   :  { %v1681_v12 = vadd.f32 %v409_v61, %v329_v56  ;;  %v1711_v56 = vmul.f32 -1.0, %v1295_v18  ;;  %v454_v15 = vadd.f32 %v443_v26, %v390_v3  ;;  %v1764_v61 = vmul.f32 %v874_v9, %v1221_v1  ;;  %v2244_v1 = vld [vmem:[#allocation17_spill] sm:$0xff] }
 0x186   :  { %v1791_v10 = vmul.f32 %v791_v40, %v2244_v1  ;;  %v1805_v13 = vmul.f32 %v874_v9, %v2244_v1 }
 0x187   :  { %v518_v50 = vadd.f32 %v1435_v52, %v454_v15 }
 0x188   :  { %v445_v62 = vpop.permute.xlu1 %444  ;;  %v447_v11 = vpop.permute.xlu0 %446 }
 0x189   :  { %v455_v28 = vadd.f32 %v445_v62, %v391_v42  ;;  %v2242_v62 = vld [vmem:[#allocation19_spill] sm:$0xff] }
 0x18a   :  { %v1775_v34 = vmul.f32 %v791_v40, %v2242_v62 }
 0x18b   :  { %v519_v36 = vadd.f32 %v2245_v45, %v455_v28  ;;  %v1831_v45 = vstv %s1757_s23 }
 0x18c   :  { %v1683_v22 = vpop.permute.xlu1 %448  ;;  %v567_v35 = vpop.permute.xlu0 %566 }
 0x18d   :  { %v578_v52 = vadd.f32 %v567_v35, %v518_v50  ;;  %v1802_v35 = vmul.f32 %v874_v9, %v2242_v62 }
 0x190   :  { %v1689_v33 = vpop.permute.xlu1 %568  ;;  %v1691_v0 = vpop.permute.xlu0 %570 }
 0x194   :  { %v1723_v14 = vpop.permute.xlu1 %572  ;;  %v1725_v41 = vpop.permute.xlu0 %634 }
 0x195   :  { %v646_v31 = vadd.f32 %v1725_v41, %v1528_v5  ;;  %v456_v5 = vadd.f32 %v447_v11, %v392_v16  ;;  %v579_v16 = vadd.f32 %v1689_v33, %v519_v36  ;;  %v1834_v36 = vmul.f32 %v957_v49, %v2244_v1 }
 0x197   :  { %v1782_v11 = vmul.f32 0.11111111, %v646_v31  ;;  %v520_v54 = vadd.f32 %v2246_v39, %v456_v5  ;;  %v1822_v5 = vmul.f32 %v957_v49, %v2242_v62  ;;  %v1840_v39 = vstv %s1766_s24 }
 0x198   :  { %v1750_v4 = vpop.permute.xlu1 %636  ;;  %v1752_v27 = vpop.permute.xlu0 %638 }
 0x199   :  { %v647_v26 = vadd.f32 %v1750_v4, %v1538_v32  ;;  %v648_v53 = vadd.f32 %v1752_v27, %v2243_v6  ;;  %v457_v32 = vadd.f32 %v1683_v22, %v393_v7  ;;  %v2247_v22 = vld [vmem:[#allocation18_spill] sm:$0xff]  ;;  %v580_v50 = vadd.f32 %v1691_v0, %v520_v54 }
 0x19a   :  { %v1809_v15 = vmul.f32 %v791_v40, %v2247_v22  ;;  %v1812_v42 = vmul.f32 %v874_v9, %v2247_v22  ;;  %v702_v9 = vmul.f32 %v1782_v11, %v1782_v11  ;;  %v2249_v7 = vld [vmem:[#allocation22_spill] sm:$0xff]  ;;  %v1837_v62 = vmul.f32 %v957_v49, %v2247_v22 }
 0x19b   :  { %v1815_v31 = vmul.f32 0.11111111, %v647_v26  ;;  %v1825_v40 = vmul.f32 0.11111111, %v648_v53  ;;  %v521_v26 = vadd.f32 %v2249_v7, %v457_v32  ;;  %v1856_v7 = vstv %s1788_s26 }
 0x19c   :  { %v1795_v37 = vpop.permute.xlu1 %640  ;;  %v651_v3 = vpop.permute.xlu0 %650  ;;  %2252 = vst [vmem:[#allocation17_spill] sm:$0xff] %v1856_v7 }
 0x19d   :  { %v662_v58 = vadd.f32 %v651_v3, %v578_v52  ;;  %v649_v28 = vadd.f32 %v1795_v37, %v2248_v8  ;;  %v581_v32 = vadd.f32 %v1723_v14, %v521_v26  ;;  %v703_v1 = vmul.f32 %v1815_v31, %v1815_v31 }
 0x19e   :  { %v704_v22 = vmul.f32 %v1825_v40, %v1825_v40  ;;  %v1859_v14 = vstv %s1797_s27 }
 0x19f   :  { %v698_v33 = vmul.f32 0.11111111, %v662_v58  ;;  %v1843_v54 = vmul.f32 0.11111111, %v649_v28  ;;  %v1848_v58 = vstv %s1780_s1  ;;  %2253 = vst [vmem:[#allocation20_spill] sm:$0xff] %v1859_v14  ;;  %v1862_v28 = vstv %s1799_s28 }
 0x1a0   :  { %v653_v52 = vpop.permute.xlu1 %652  ;;  %v655_v6 = vpop.permute.xlu0 %654  ;;  %2250 = vst [vmem:[#allocation19_spill] sm:$0xff] %v1848_v58  ;;  %2254 = vst [vmem:[#allocation21_spill] sm:$0xff] %v1862_v28  ;;  %v798_v58 = vmul.f32 %v1755_v2, %v1782_v11 }
 0x1a1   :  { %v706_v0 = vsub.f32 %v698_v33, %v702_v9  ;;  %v663_v53 = vadd.f32 %v653_v52, %v579_v16  ;;  %v664_v3 = vadd.f32 %v655_v6, %v580_v50  ;;  %v1853_v33 = vstv %s1786_s25 }
 0x1a2   :  { %2251 = vst [vmem:[#allocation23_spill] sm:$0xff] %v1853_v33  ;;  %v1872_v33 = vstv %s1819_s29 }
 0x1a3   :  { %v710_v8 = vmax.f32 %v706_v0, 0.0  ;;  %v699_v49 = vmul.f32 0.11111111, %v663_v53  ;;  %v700_v16 = vmul.f32 0.11111111, %v664_v3  ;;  %v705_v53 = vmul.f32 %v1843_v54, %v1843_v54 }
 0x1a4   :  { %v657_v9 = vpop.permute.xlu1 %656  ;;  %v491_v50 = vpop.permute.xlu0 %490 }
 0x1a5   :  { %v1864_v26 = vadd.f32 1e-08, %v710_v8  ;;  %v707_v52 = vsub.f32 %v699_v49, %v703_v1  ;;  %v708_v6 = vsub.f32 %v700_v16, %v704_v22  ;;  %v665_v0 = vadd.f32 %v657_v9, %v581_v32 }
 0x1a6   :  { %v502_v3 = vadd.f32 %v491_v50, %v1733_v60  ;;  %v538_v32 = vadd.f32 %v1289_v17, %v1658_v51  ;;  %v539_v60 = vadd.f32 %v1295_v18, %v1665_v47  ;;  %v881_v22 = vmul.f32 %v1760_v24, %v1782_v11 }
 0x1a7   :  { %1096 = vrsqrt.f32 %v1864_v26  ;;  %v711_v7 = vmax.f32 %v707_v52, 0.0  ;;  %v712_v14 = vmax.f32 %v708_v6, 0.0  ;;  %v701_v28 = vmul.f32 0.11111111, %v665_v0 }
 0x1a8   :  { %v534_v8 = vadd.f32 %v1707_v23, %v502_v3  ;;  %v493_v1 = vpop.permute.xlu1 %492  ;;  %v495_v49 = vpop.permute.xlu0 %494  ;;  %v540_v6 = vadd.f32 %v1297_v19, %v1667_v30  ;;  %v541_v17 = vadd.f32 %v1307_v21, %v1671_v20  ;;  %v964_v18 = vmul.f32 %v1778_v29, %v1782_v11 }
 0x1a9   :  { %v1882_v16 = vadd.f32 1e-08, %v711_v7  ;;  %v1884_v9 = vadd.f32 1e-08, %v712_v14  ;;  %v709_v50 = vsub.f32 %v701_v28, %v705_v53  ;;  %v503_v52 = vadd.f32 %v493_v1, %v1735_v48 }
 0x1aa   :  { %v504_v23 = vadd.f32 %v495_v49, %v1737_v55  ;;  %v1896_v47 = vadd.f32 %v798_v58, %v1746_v43  ;;  %v799_v48 = vmul.f32 %v1755_v2, %v1815_v31  ;;  %v800_v21 = vmul.f32 %v1755_v2, %v1825_v40 }
 0x1ab   :  { %1098 = vrsqrt.f32 %v1882_v16  ;;  %v713_v51 = vmax.f32 %v709_v50, 0.0  ;;  %v535_v55 = vadd.f32 %v1711_v56, %v503_v52  ;;  %v1905_v20 = vadd.f32 %v881_v22, %v1764_v61 }
 0x1ac   :  { %v536_v7 = vadd.f32 %v1719_v38, %v504_v23  ;;  %v497_v19 = vpop.permute.xlu1 %496  ;;  %v619_v30 = vpop.permute.xlu0 %618  ;;  %1100 = vrsqrt.f32 %v1884_v9  ;;  %v686_v43 = vadd.f32 %v1725_v41, %v534_v8  ;;  %v882_v56 = vmul.f32 %v1760_v24, %v1815_v31 }
 0x1ad   :  { %v505_v11 = vadd.f32 %v497_v19, %v1743_v63  ;;  %v630_v58 = vadd.f32 %v619_v30, %v538_v32  ;;  %v883_v38 = vmul.f32 %v1760_v24, %v1825_v40  ;;  %v1915_v14 = vadd.f32 %v964_v18, %v1769_v44 }
 0x1ae   :  { %v1919_v61 = vmul.f32 %v1778_v29, %v1815_v31  ;;  %v1921_v28 = vadd.f32 1e-08, %v713_v51  ;;  %v1925_v63 = vadd.f32 %v799_v48, %v1775_v34  ;;  %v1929_v53 = vmul.f32 %v1778_v29, %v1825_v40 }
 0x1af   :  { %v690_v0 = vadd.f32 %v1725_v41, %v630_v58  ;;  %v687_v3 = vadd.f32 %v1750_v4, %v535_v55  ;;  %v688_v44 = vadd.f32 %v1752_v27, %v536_v7  ;;  %v537_v8 = vadd.f32 %v1729_v57, %v505_v11 }
 0x1b0   :  { %v621_v1 = vpop.permute.xlu1 %620  ;;  %v623_v31 = vpop.permute.xlu0 %622  ;;  %v1935_v49 = vadd.f32 %v800_v21, %v1791_v10  ;;  %v746_v41 = vmul.f32 %v686_v43, %v686_v43  ;;  %vm720_vm3 = vcmp.eq.f32.partialorder %v1864_v26, inf  ;;  %vm722_vm4 = vcmp.eq.f32.partialorder %v1864_v26, 0.0 }
 0x1b1   :  { %v1097_v32 = vpop.eup %1096  ;;  %v750_v22 = vmul.f32 %v690_v0, %v690_v0  ;;  %v631_v34 = vadd.f32 %v621_v1, %v539_v60  ;;  %v632_v50 = vadd.f32 %v623_v31, %v540_v6  ;;  %v723_v40 = vand.u32 2147483648, %v1864_v26 }
 0x1b2   :  { %v719_v52 = vmul.f32 %v1097_v32, %v1864_v26  ;;  %1102 = vrsqrt.f32 %v1921_v28  ;;  %v747_v18 = vmul.f32 %v687_v3, %v687_v3  ;;  %v748_v51 = vmul.f32 %v688_v44, %v688_v44 }
 0x1b3   :  { %v754_v57 = vadd.f32 %v750_v22, %v746_v41  ;;  %v691_v23 = vadd.f32 %v1750_v4, %v631_v34  ;;  %v692_v10 = vadd.f32 %v1752_v27, %v632_v50  ;;  %v689_v60 = vadd.f32 %v1795_v37, %v537_v8 }
 0x1b4   :  { %v625_v6 = vpop.permute.xlu1 %624  ;;  %v463_v48 = vpop.permute.xlu0 %462  ;;  %v721_v55 = vsel %vm720_vm3, %v1864_v26, %v719_v52  ;;  %v1954_v27 = vadd.f32 %v882_v56, %v1802_v35  ;;  %v1957_v58 = vadd.f32 %v883_v38, %v1805_v13  ;;  %vm727_vm5 = vcmp.eq.f32.partialorder %v1882_v16, inf }
 0x1b5   :  { %v1099_v7 = vpop.eup %1098  ;;  %v1946_v19 = vadd.f32 1e-08, %v754_v57  ;;  %v751_v30 = vmul.f32 %v691_v23, %v691_v23  ;;  %v752_v21 = vmul.f32 %v692_v10, %v692_v10  ;;  %v633_v43 = vadd.f32 %v625_v6, %v541_v17 }
 0x1b6   :  { %v1950_v11 = vsel %vm722_vm4, %v723_v40, %v721_v55  ;;  %v726_v4 = vmul.f32 %v1099_v7, %v1882_v16  ;;  %v1101_v0 = vpop.eup %1100  ;;  %v730_v26 = vand.u32 2147483648, %v1882_v16  ;;  %v801_v35 = vmul.f32 %v1755_v2, %v1843_v54  ;;  %v2255_v55 = vld [vmem:[#allocation25_spill] sm:$0xff] }
 0x1b7   :  { %1104 = vrsqrt.f32 %v1946_v19  ;;  %v755_v3 = vadd.f32 %v751_v30, %v747_v18  ;;  %v756_v44 = vadd.f32 %v752_v21, %v748_v51  ;;  %v693_v8 = vadd.f32 %v1795_v37, %v633_v43 }
 0x1b8   :  { %v465_v17 = vpop.permute.xlu1 %464  ;;  %v467_v1 = vpop.permute.xlu0 %466  ;;  %v884_v13 = vmul.f32 %v1760_v24, %v1843_v54  ;;  %v749_v56 = vmul.f32 %v689_v60, %v689_v60  ;;  %v808_v37 = vmul.f32 %v1831_v45, %v1950_v11  ;;  %v728_v41 = vsel %vm727_vm5, %v1882_v16, %v726_v4 }
 0x1b9   :  { %v1967_v38 = vadd.f32 1e-08, %v755_v3  ;;  %v1969_v31 = vadd.f32 1e-08, %v756_v44  ;;  %v753_v32 = vmul.f32 %v693_v8, %v693_v8  ;;  %vm729_vm6 = vcmp.eq.f32.partialorder %v1882_v16, 0.0 }
 0x1ba   :  { %v733_v22 = vmul.f32 %v1101_v0, %v1884_v9  ;;  %v1977_v34 = vsel %vm729_vm6, %v730_v26, %v728_v41  ;;  %v967_v24 = vmul.f32 %v1778_v29, %v1843_v54  ;;  %v1983_v40 = vadd.f32 %v808_v37, %v1896_v47 }
 0x1bb   :  { %1106 = vrsqrt.f32 %v1967_v38  ;;  %v757_v2 = vadd.f32 %v753_v32, %v749_v56  ;;  %v1987_v16 = vadd.f32 %v1919_v61, %v1822_v5  ;;  %v1991_v57 = vadd.f32 %v1929_v53, %v1834_v36 }
 0x1bc   :  { %1108 = vrsqrt.f32 %v1969_v31  ;;  %v469_v50 = vpop.permute.xlu1 %468  ;;  %v591_v52 = vpop.permute.xlu0 %590  ;;  %v474_v29 = vadd.f32 %v463_v48, %v1675_v25  ;;  %vm734_vm7 = vcmp.eq.f32.partialorder %v1884_v9, inf  ;;  %v737_v54 = vand.u32 2147483648, %v1884_v9 }
 0x1bd   :  { %v1103_v23 = vpop.eup %1102  ;;  %v1993_v10 = vadd.f32 1e-08, %v757_v2  ;;  %v809_v47 = vmul.f32 %v1831_v45, %v1977_v34  ;;  %v735_v18 = vsel %vm734_vm7, %v1884_v9, %v733_v22  ;;  %vm736_vm8 = vcmp.eq.f32.partialorder %v1884_v9, 0.0 }
 0x1be   :  { %v805_v5 = vadd.f32 %v801_v35, %v1809_v15  ;;  %v2004_v36 = vsel %vm736_vm8, %v737_v54, %v735_v18  ;;  %v888_v61 = vadd.f32 %v884_v13, %v1812_v42  ;;  %v2008_v25 = vadd.f32 %v967_v24, %v1837_v62  ;;  %v2257_v13 = vld [vmem:[#allocation27_spill] sm:$0xff]  ;;  %v2258_v54 = vld [vmem:[#allocation28_spill] sm:$0xff] }
 0x1bf   :  { %1110 = vrsqrt.f32 %v1993_v10  ;;  %v2011_v60 = vadd.f32 %v809_v47, %v1925_v63  ;;  %v810_v6 = vmul.f32 %v1831_v45, %v2004_v36  ;;  %v740_v9 = vmul.f32 %v1103_v23, %v1921_v28 }
 0x1c0   :  { %v593_v53 = vpop.permute.xlu1 %592  ;;  %v595_v51 = vpop.permute.xlu0 %594  ;;  %vm741_vm9 = vcmp.eq.f32.partialorder %v1921_v28, inf  ;;  %v475_v48 = vadd.f32 %v465_v17, %v1677_v46  ;;  %v526_v42 = vadd.f32 %v2255_v55, %v474_v29  ;;  %vm743_vm10 = vcmp.eq.f32.partialorder %v1921_v28, 0.0  ;;  %v2256_v17 = vld [vmem:[#allocation26_spill] sm:$0xff] }
 0x1c1   :  { %v1105_v15 = vpop.eup %1104  ;;  %v744_v62 = vand.u32 2147483648, %v1921_v28  ;;  %v476_v7 = vadd.f32 %v467_v1, %v1679_v59  ;;  %vm764_vm11 = vcmp.eq.f32.partialorder %v1946_v19, inf  ;;  %v2024_v63 = vadd.f32 %v810_v6, %v1935_v49 }
 0x1c2   :  { %v742_v30 = vsel %vm741_vm9, %v1921_v28, %v740_v9  ;;  %v763_v21 = vmul.f32 %v1105_v15, %v1946_v19  ;;  %vm766_vm12 = vcmp.eq.f32.partialorder %v1946_v19, 0.0  ;;  %v891_v43 = vmul.f32 %v1840_v39, %v1950_v11 }
 0x1c3   :  { %v2029_v46 = vsel %vm743_vm10, %v744_v62, %v742_v30  ;;  %v892_v49 = vmul.f32 %v1840_v39, %v1977_v34  ;;  %v893_v28 = vmul.f32 %v1840_v39, %v2004_v36  ;;  %v477_v8 = vadd.f32 %v469_v50, %v1681_v12 }
 0x1c4   :  { %v597_v4 = vpop.permute.xlu1 %596  ;;  %v671_v0 = vpop.permute.xlu0 %670  ;;  %v811_v59 = vmul.f32 %v1831_v45, %v2029_v46  ;;  %v894_v3 = vmul.f32 %v1840_v39, %v2029_v46  ;;  %v527_v1 = vadd.f32 %v2256_v17, %v475_v48  ;;  %v767_v26 = vand.u32 2147483648, %v1946_v19 }
 0x1c5   :  { %v1107_v44 = vpop.eup %1106  ;;  %v2045_v35 = vadd.f32 %v891_v43, %v1905_v20  ;;  %v528_v56 = vadd.f32 %v2257_v13, %v476_v7  ;;  %vm771_vm13 = vcmp.eq.f32.partialorder %v1967_v38, inf  ;;  %v602_v39 = vadd.f32 %v591_v52, %v526_v42 }
 0x1c6   :  { %v1109_v45 = vpop.eup %1108  ;;  %v770_v32 = vmul.f32 %v1107_v44, %v1967_v38  ;;  %v2050_v37 = vadd.f32 %v811_v59, %v805_v5  ;;  %v765_v12 = vsel %vm764_vm11, %v1946_v19, %v763_v21  ;;  %vm773_vm14 = vcmp.eq.f32.partialorder %v1967_v38, 0.0 }
 0x1c7   :  { %v777_v41 = vmul.f32 %v1109_v45, %v1969_v31  ;;  %v774_v2 = vand.u32 2147483648, %v1967_v38  ;;  %v2059_v24 = vadd.f32 %v892_v49, %v1954_v27  ;;  %v2062_v50 = vadd.f32 %v893_v28, %v1957_v58 }
 0x1c8   :  { %v673_v20 = vpop.permute.xlu1 %672  ;;  %v675_v22 = vpop.permute.xlu0 %674  ;;  %v2064_v23 = vadd.f32 %v894_v3, %v888_v61  ;;  %v603_v29 = vadd.f32 %v593_v53, %v527_v1  ;;  %v529_v47 = vadd.f32 %v2258_v54, %v477_v8  ;;  %v772_v18 = vsel %vm771_vm13, %v1967_v38, %v770_v32  ;;  %v2259_v61 = vld [vmem:[#allocation19_spill] sm:$0xff] }
 0x1c9   :  { %v1111_v52 = vpop.eup %1110  ;;  %vm778_vm15 = vcmp.eq.f32.partialorder %v1969_v31, inf  ;;  %v2071_v5 = vsel %vm766_vm12, %v767_v26, %v765_v12  ;;  %v974_v6 = vmul.f32 %v2259_v61, %v1950_v11  ;;  %v2077_v9 = vadd.f32 %v671_v0, %v602_v39  ;;  %v2260_v11 = vld [vmem:[#allocation20_spill] sm:$0xff]  ;;  %v2261_v0 = vld [vmem:[#allocation23_spill] sm:$0xff] }
 0x1ca   :  { %v779_v27 = vsel %vm778_vm15, %v1969_v31, %v777_v41  ;;  %v784_v58 = vmul.f32 %v1111_v52, %v1993_v10  ;;  %v2079_v53 = vadd.f32 %v673_v20, %v603_v29  ;;  %vm780_vm1 = vcmp.eq.f32.partialorder %v1969_v31, 0.0  ;;  %v2262_v41 = vld [vmem:[#allocation21_spill] sm:$0xff] }
 0x1cb   :  { %v781_v15 = vand.u32 2147483648, %v1969_v31  ;;  %v604_v48 = vadd.f32 %v595_v51, %v528_v56  ;;  %v2085_v42 = vsel %vm773_vm14, %v774_v2, %v772_v18  ;;  %vm785_vm2 = vcmp.eq.f32.partialorder %v1993_v10, inf }
 0x1cc   :  { %v677_v19 = vpop.permute.xlu1 %676  ;;  %v827_v55 = vpop.permute.xlu0 %826  ;;  %vm787_vm3 = vcmp.eq.f32.partialorder %v1993_v10, 0.0  ;;  %v844_v62 = vmul.f32 %v2260_v11, %v2071_v5  ;;  %v786_v31 = vsel %vm785_vm2, %v1993_v10, %v784_v58  ;;  %v605_v51 = vadd.f32 %v597_v4, %v529_v47 }
 0x1cd   :  { %v838_v7 = vadd.f32 %v827_v55, %v1983_v40  ;;  %v2092_v30 = vsel %vm780_vm1, %v781_v15, %v779_v27  ;;  %v2095_v21 = vadd.f32 %v675_v22, %v604_v48  ;;  %v788_v38 = vand.u32 2147483648, %v1993_v10 }
 0x1ce   :  { %v2099_v43 = vadd.f32 %v974_v6, %v1915_v14  ;;  %v854_v59 = vmul.f32 %v2261_v0, %v2077_v9  ;;  %v855_v49 = vmul.f32 %v2261_v0, %v2079_v53  ;;  %v845_v40 = vmul.f32 %v2260_v11, %v2085_v42 }
 0x1cf   :  { %v848_v28 = vadd.f32 %v844_v62, %v838_v7  ;;  %v846_v4 = vmul.f32 %v2260_v11, %v2092_v30  ;;  %v2111_v8 = vsel %vm787_vm3, %v788_v38, %v786_v31  ;;  %v975_v14 = vmul.f32 %v2259_v61, %v1977_v34 }
 0x1d0   :  { %v829_v3 = vpop.permute.xlu1 %828  ;;  %v831_v44 = vpop.permute.xlu0 %830  ;;  %v976_v17 = vmul.f32 %v2259_v61, %v2004_v36  ;;  %v977_v10 = vmul.f32 %v2259_v61, %v2029_v46  ;;  %v856_v13 = vmul.f32 %v2261_v0, %v2095_v21  ;;  %v2129_v56 = vadd.f32 %v677_v19, %v605_v51 }
 0x1d1   :  { %v858_v1 = vadd.f32 %v854_v59, %v848_v28  ;;  %v839_v26 = vadd.f32 %v829_v3, %v2011_v60  ;;  %v840_v45 = vadd.f32 %v831_v44, %v2024_v63  ;;  %v2132_v34 = vadd.f32 %v975_v14, %v1987_v16 }
 0x1d2   :  { %v2135_v36 = vadd.f32 %v976_v17, %v1991_v57  ;;  %v2139_v39 = vadd.f32 %v977_v10, %v2008_v25  ;;  %v847_v46 = vmul.f32 %v2260_v11, %v2111_v8  ;;  %v927_v20 = vmul.f32 %v2262_v41, %v2071_v5  ;;  %v2263_v25 = vld [vmem:[#allocation17_spill] sm:$0xff] }
 0x1d3   :  { %v864_v60 = vadd.f32 %v1872_v33, %v858_v1  ;;  %v849_v32 = vadd.f32 %v845_v40, %v839_v26  ;;  %v850_v63 = vadd.f32 %v846_v4, %v840_v45  ;;  %v937_v29 = vmul.f32 %v2263_v25, %v2077_v9 }
 0x1d4   :  { %v833_v12 = vpop.permute.xlu1 %832  ;;  %v910_v16 = vpop.permute.xlu0 %909  ;;  %v857_v54 = vmul.f32 %v2261_v0, %v2129_v56  ;;  %v946_v61 = vstv %s2113_s30  ;;  %v928_v6 = vmul.f32 %v2262_v41, %v2085_v42  ;;  %v1009_v48 = vstv %s2115_s4 }
 0x1d5   :  { %869 = vst.msk [vmem:[#allocation10] sm:$0xff] %vm868_vm0, %v864_v60  ;;  %v859_v57 = vadd.f32 %v855_v49, %v849_v32  ;;  %v860_v22 = vadd.f32 %v856_v13, %v850_v63  ;;  %v841_v2 = vadd.f32 %v833_v12, %v2050_v37  ;;  %v921_v52 = vadd.f32 %v910_v16, %v2045_v35 }
 0x1d6   :  { %v929_v35 = vmul.f32 %v2262_v41, %v2092_v30  ;;  %v1019_v7 = vstv %s2125_s0  ;;  %v938_v31 = vmul.f32 %v2263_v25, %v2079_v53  ;;  %v939_v51 = vmul.f32 %v2263_v25, %v2095_v21 }
 0x1d7   :  { %v865_v47 = vadd.f32 %v1872_v33, %v859_v57  ;;  %v866_v18 = vadd.f32 %v1872_v33, %v860_v22  ;;  %v851_v27 = vadd.f32 %v847_v46, %v841_v2  ;;  %v931_v58 = vadd.f32 %v927_v20, %v921_v52 }
 0x1d8   :  { %v912_v37 = vpop.permute.xlu1 %911  ;;  %v914_v15 = vpop.permute.xlu0 %913  ;;  %v930_v28 = vmul.f32 %v2262_v41, %v2111_v8  ;;  %v1020_v14 = vmul.f32 %v1019_v7, %v2077_v9  ;;  %v940_v17 = vmul.f32 %v2263_v25, %v2129_v56  ;;  %v1029_v10 = vstv %s1078_s5 }
 0x1d9   :  { %870 = vst.msk [vmem:[#allocation10 + $0x8] sm:$0xff] %vm868_vm0, %v865_v47  ;;  %871 = vst.msk [vmem:[#allocation10 + $0x30] sm:$0xff] %vm868_vm0, %v866_v18  ;;  %v861_v19 = vadd.f32 %v857_v54, %v851_v27  ;;  %v941_v55 = vadd.f32 %v937_v29, %v931_v58  ;;  %v922_v11 = vadd.f32 %v912_v37, %v2059_v24 }
 0x1da   :  { %v923_v62 = vadd.f32 %v914_v15, %v2062_v50  ;;  %v1010_v24 = vmul.f32 %v1009_v48, %v2071_v5  ;;  %v1011_v13 = vmul.f32 %v1009_v48, %v2085_v42  ;;  %v1012_v32 = vmul.f32 %v1009_v48, %v2092_v30 }
 0x1db   :  { %v867_v38 = vadd.f32 %v1872_v33, %v861_v19  ;;  %v947_v0 = vadd.f32 %v946_v61, %v941_v55  ;;  %v932_v59 = vadd.f32 %v928_v6, %v922_v11  ;;  %v1021_v12 = vmul.f32 %v1019_v7, %v2079_v53 }
 0x1dc   :  { %v933_v49 = vadd.f32 %v929_v35, %v923_v62  ;;  %v916_v40 = vpop.permute.xlu1 %915  ;;  %v993_v3 = vpop.permute.xlu0 %992  ;;  %v1022_v41 = vmul.f32 %v1019_v7, %v2095_v21  ;;  %v1013_v52 = vmul.f32 %v1009_v48, %v2111_v8 }
 0x1dd   :  { %872 = vst.msk [vmem:[#allocation10 + $0x38] sm:$0xff] %vm868_vm0, %v867_v38  ;;  %952 = vst.msk [vmem:[#allocation10 + $0x10] sm:$0xff] %vm868_vm0, %v947_v0  ;;  %v942_v50 = vadd.f32 %v938_v31, %v932_v59  ;;  %v924_v44 = vadd.f32 %v916_v40, %v2064_v23  ;;  %v1004_v33 = vadd.f32 %v993_v3, %v2099_v43 }
 0x1de   :  { %v943_v4 = vadd.f32 %v939_v51, %v933_v49 }
 0x1df   :  { %v948_v1 = vadd.f32 %v946_v61, %v942_v50  ;;  %v934_v45 = vadd.f32 %v930_v28, %v924_v44  ;;  %v1014_v5 = vadd.f32 %v1010_v24, %v1004_v33 }
 0x1e0   :  { %v949_v26 = vadd.f32 %v946_v61, %v943_v4  ;;  %v995_v60 = vpop.permute.xlu1 %994  ;;  %v997_v63 = vpop.permute.xlu0 %996 }
 0x1e1   :  { %953 = vst.msk [vmem:[#allocation10 + $0x18] sm:$0xff] %vm868_vm0, %v948_v1  ;;  %v944_v23 = vadd.f32 %v940_v17, %v934_v45  ;;  %v1024_v9 = vadd.f32 %v1020_v14, %v1014_v5  ;;  %v1005_v43 = vadd.f32 %v995_v60, %v2132_v34  ;;  %v1006_v46 = vadd.f32 %v997_v63, %v2135_v36 }
 0x1e2   :  { %954 = vst.msk [vmem:[#allocation10 + $0x40] sm:$0xff] %vm868_vm0, %v949_v26  ;;  %v1023_v36 = vmul.f32 %v1019_v7, %v2129_v56 }
 0x1e3   :  { %v950_v20 = vadd.f32 %v946_v61, %v944_v23  ;;  %v1030_v42 = vadd.f32 %v1029_v10, %v1024_v9  ;;  %v1015_v16 = vadd.f32 %v1011_v13, %v1005_v43  ;;  %v1016_v57 = vadd.f32 %v1012_v32, %v1006_v46 }
 0x1e4   :  { %v999_v30 = vpop.permute.xlu1 %998 }
 0x1e5   :  { %955 = vst.msk [vmem:[#allocation10 + $0x48] sm:$0xff] %vm868_vm0, %v950_v20  ;;  %1035 = vst.msk [vmem:[#allocation10 + $0x20] sm:$0xff] %vm868_vm0, %v1030_v42  ;;  %v1025_v22 = vadd.f32 %v1021_v12, %v1015_v16  ;;  %v1026_v2 = vadd.f32 %v1022_v41, %v1016_v57  ;;  %v1007_v34 = vadd.f32 %v999_v30, %v2139_v39 }
 0x1e7   :  { %v1031_v53 = vadd.f32 %v1029_v10, %v1025_v22  ;;  %v1032_v25 = vadd.f32 %v1029_v10, %v1026_v2  ;;  %v1017_v21 = vadd.f32 %v1013_v52, %v1007_v34 }
 0x1e9   :  { %1036 = vst.msk [vmem:[#allocation10 + $0x28] sm:$0xff] %vm868_vm0, %v1031_v53  ;;  %1037 = vst.msk [vmem:[#allocation10 + $0x50] sm:$0xff] %vm868_vm0, %v1032_v25  ;;  %v1027_v29 = vadd.f32 %v1023_v36, %v1017_v21 }
 0x1eb   :  { %v1033_v54 = vadd.f32 %v1029_v10, %v1027_v29 }
 0x1ed   :  { %1038 = vst.msk [vmem:[#allocation10 + $0x58] sm:$0xff] %vm868_vm0, %v1033_v54 }
 0x1ee   :  { %1145 = shalt.err (!%p1142_p12)
}
 0x1ef   :  { %s1146_s11 = scalar_lea.hbm %s2211_s3, 1536 }
 0x1f0   :  { %p1147_p13 = scmp.ne.s32.totalorder %s2211_s3, %s1146_s11  ;;  %p1150_p0 = scmp.lt.u32.totalorder %s1146_s11, %s2211_s3 }
 0x1f2   :  { %p1152_p1 = pnand %p1150_p0, %p1147_p13 }
 0x1f4   :  { %1155 = shalt.err (!%p1152_p1)
}
 0x1f5   :  { %s1179_s15 = smov 128   ;;  %s1180_s16 = smov 8  }
 0x1f6   :  { %1050 = dma.vmem_to_hbm [thread:$0]  %s1045_s7, 1536, %s2211_s3, [#allocation5], %s1179_s15, %s1179_s15, %s1180_s16  }
 0x1f7   :  { %1162 = dma.done.wait [#allocation5], 1536  }
 0x1f8   :  { %1163 = vsyncadd [#allocation5], 4294965760 }
 0x1f9   :  { %1054 = vsyncpa [#allocation4], 1 }
 0x1fa   :  { %1055 = vsyncpa [#allocation5], 1 }
 0x1fb   :  { %1056 = vsyncpa [#allocation6], 1 }
 0x1fc   :  { %1057 = vsyncpa [#allocation7], 1 }

</bundles_post_ra>
